<compile_context>
chip_gen: v7x
topology: tpu7x:2x2x1
jax: 0.10.0
libtpu: 0.0.40
codegen_flags: <defaults>
</compile_context>

<pallas_src>
import jax
import jax.numpy as jnp
from jax.experimental import pallas as pl
from jax.experimental.pallas import tpu as pltpu

EPS = 1e-5


def _hswish(x):
    return x * jnp.clip(x + 3.0, 0.0, 6.0) * (1.0 / 6.0)


def _hsigmoid(x):
    return jnp.clip(x + 3.0, 0.0, 6.0) * (1.0 / 6.0)


def _bn_rows(x, gamma, beta):
    # BatchNorm with stats over axis 0 (SE branch, spatial 1x1; also used by
    # the pure-JAX reference).
    mean = jnp.mean(x, axis=0, keepdims=True)
    var = jnp.mean(x * x, axis=0, keepdims=True) - mean * mean
    return (x - mean) * jax.lax.rsqrt(var + EPS) * gamma + beta


def _bn_folded(x, fold, rep, gamma, beta, inv_m):
    """Training-mode BatchNorm on a lane-folded (rows, W*C) f32 slab.

    Row reduction runs on the XLU (jnp.sum over sublanes); `fold` (W*C, C)
    reduces the W lane replicas of each channel on the MXU; `rep` (= fold.T)
    broadcasts the per-channel scale/shift back to the folded lanes.
    """
    f32 = jnp.float32
    s1 = jnp.dot(jnp.sum(x, axis=0, keepdims=True), fold,
                 preferred_element_type=f32)                     # (1, C) sum x
    s2 = jnp.dot(jnp.sum(x * x, axis=0, keepdims=True), fold,
                 preferred_element_type=f32)                     # (1, C) sum x^2
    mean = s1 * inv_m
    var = s2 * inv_m - mean * mean
    a = gamma * jax.lax.rsqrt(var + EPS)                         # (1, C)
    b = beta - mean * a
    a_f = jnp.dot(a, rep, preferred_element_type=f32)            # (1, W*C)
    b_f = jnp.dot(b, rep, preferred_element_type=f32)
    return x * a_f + b_f


def _block_kernel(xf_ref, w1c_ref, w3f_ref, wtap_ref, hmask_ref,
                  fe_ref, repe_ref, fo_ref, repo_ref, pool_ref,
                  bnp_ref, wse1_ref, wse2_ref, out_ref):
    f32 = jnp.float32
    bf16 = jnp.bfloat16

    NH = xf_ref.shape[0]                  # N * H
    N = pool_ref.shape[0]
    H = NH // N
    WCe, Ce = fe_ref.shape                # W*expand_size, expand_size
    WCout, Cout = fo_ref.shape
    W = WCe // Ce
    K = hmask_ref.shape[1]
    pad = K // 2
    Cse = wse1_ref.shape[1]
    inv_m = 1.0 / float(NH * W)           # 1 / (N*H*W)

    # Packed per-channel BN affine parameters (one consolidated slab).
    g1, b1 = bnp_ref[0:1, :Ce], bnp_ref[1:2, :Ce]
    g2, b2 = bnp_ref[2:3, :Ce], bnp_ref[3:4, :Ce]
    g3, b3 = bnp_ref[4:5, :Cout], bnp_ref[5:6, :Cout]
    gsc, bsc = bnp_ref[6:7, :Cout], bnp_ref[7:8, :Cout]
    gse1, bse1 = bnp_ref[8:9, :Cse], bnp_ref[9:10, :Cse]
    gse2, bse2 = bnp_ref[10:11, :Ce], bnp_ref[11:12, :Ce]

    # ---- conv1 (1x1 expand) fused with the 1x1 shortcut conv ---------------
    # One bf16 MXU matmul, f32 accumulation.
    y = jnp.dot(xf_ref[...], w1c_ref[...], preferred_element_type=f32)
    out1 = y[:, :WCe]                     # folded expand branch
    sc = y[:, WCe:]                       # folded shortcut branch

    out1 = _hswish(_bn_folded(out1, fe_ref[...], repe_ref[...], g1, b1, inv_m))

    # ---- depthwise KxK (stride 1, pad K//2): XLU rolls + VPU MAC -----------
    #   dy -> sublane roll over the N*H rows, masked by the h-validity column
    #   dx -> lane roll by ox*Ce, w-edge zeros baked into the tap weight row
    ctr = pad * K + pad
    acc = out1 * wtap_ref[ctr:ctr + 1, :]
    for dy in range(K):
        oy = dy - pad
        if oy == 0:
            rsh = out1
        else:
            rsh = pltpu.roll(out1, (-oy) % NH, 0) * hmask_ref[:, dy:dy + 1]
        for dx in range(K):
            ox = dx - pad
            if oy == 0 and ox == 0:
                continue
            t = dy * K + dx
            xs = rsh if ox == 0 else pltpu.roll(rsh, (-ox * Ce) % WCe, 1)
            acc = acc + xs * wtap_ref[t:t + 1, :]

    out2 = _bn_folded(acc, fe_ref[...], repe_ref[...], g2, b2, inv_m)

    # ---- SE: avg-pool (MXU), FC -> BN -> ReLU -> FC -> BN -> hsigmoid gate -
    pooled = jnp.dot(jnp.dot(pool_ref[...], out2, preferred_element_type=f32),
                     fe_ref[...], preferred_element_type=f32) * (1.0 / float(H * W))
    s = jnp.dot(pooled, wse1_ref[...], preferred_element_type=f32)    # (N, Cse)
    s = jnp.maximum(_bn_rows(s, gse1, bse1), 0.0)
    s = jnp.dot(s, wse2_ref[...], preferred_element_type=f32)         # (N, Ce)
    s = _hsigmoid(_bn_rows(s, gse2, bse2))
    s_lane = jnp.dot(s, repe_ref[...], preferred_element_type=f32)    # (N, W*Ce)
    gated = jnp.concatenate(
        [out2[n * H:(n + 1) * H, :] * s_lane[n:n + 1, :] for n in range(N)],
        axis=0)                                                       # (N*H, W*Ce)

    # ---- nolinear2 + conv3 (1x1 project, folded bf16 MXU) + bn3 ------------
    out3 = jnp.dot(_hswish(gated).astype(bf16), w3f_ref[...],
                   preferred_element_type=f32)                        # (N*H, W*Cout)
    out3 = _bn_folded(out3, fo_ref[...], repo_ref[...], g3, b3, inv_m)

    # ---- shortcut BN + residual add; 128-lane-dense unmasked store ---------
    sc = _bn_folded(sc, fo_ref[...], repo_ref[...], gsc, bsc, inv_m)
    out_ref[...] = out3 + sc


def make_block_constants(params, *, batch, height, width, kernel_size):
    """All constant kernel operands.  Pure function of the weights and static
    shapes — build ONCE at parameter-prep time, reuse on every call."""
    f32, bf16 = jnp.float32, jnp.bfloat16
    N, H, W, K = batch, height, width, kernel_size
    pad = K // 2
    Cin, Ce = params["w1"].shape
    Cout = params["w3"].shape[1]
    Cse = params["wse1"].shape[1]

    eye_w = jnp.eye(W, dtype=f32)
    # 1x1 convs as block-diagonal ("lane-folded") matmul weights; conv1 and the
    # shortcut conv share the LHS -> concatenate their folded weights (bf16).
    w1c = jnp.concatenate([jnp.kron(eye_w, params["w1"].astype(f32)),
                           jnp.kron(eye_w, params["wsc"].astype(f32))],
                          axis=1).astype(bf16)                     # (W*Cin, W*(Ce+Cout))
    w3f = jnp.kron(eye_w, params["w3"].astype(f32)).astype(bf16)   # (W*Ce, W*Cout)

    # fold sums the W lane replicas of each channel; rep (= fold.T) broadcasts
    # per-channel scalars back across the replicas (f32: BN statistics path).
    fe = jnp.kron(jnp.ones((W, 1), f32), jnp.eye(Ce, dtype=f32))     # (W*Ce, Ce)
    fo = jnp.kron(jnp.ones((W, 1), f32), jnp.eye(Cout, dtype=f32))   # (W*Cout, Cout)
    repe, repo = fe.T, fo.T

    # SE global-average-pool matrix (per-image row reduction).
    pool = jnp.kron(jnp.eye(N, dtype=f32), jnp.ones((1, H), f32))    # (N, N*H)

    # Depthwise taps: per-tap (W*Ce,) weight rows with w-edge zeros baked in,
    # and per-dy h-validity columns for the sublane rolls.
    c = jnp.arange(W * Ce)
    w_pos, ce_pos = c // Ce, c % Ce
    r = jnp.arange(N * H)
    h_pos = r % H
    wdw = params["wdw"].astype(f32)                                  # (K*K, Ce)
    wtap, hcols = [], []
    for dy in range(K):
        oy = dy - pad
        hcols.append(((h_pos + oy >= 0) & (h_pos + oy < H)).astype(f32))
        for dx in range(K):
            ox = dx - pad
            valid_w = ((w_pos + ox >= 0) & (w_pos + ox < W)).astype(f32)
            wtap.append(wdw[dy * K + dx][ce_pos] * valid_w)
    wtap = jnp.stack(wtap)                                           # (K*K, W*Ce)
    hmask = jnp.stack(hcols, axis=1)                                 # (N*H, K)

    # All per-channel BN affine params packed into one small slab.
    P = max(Ce, Cout, Cse)
    row = lambda v: jnp.pad(v.reshape(-1).astype(f32), (0, P - v.size))
    bnp = jnp.stack([row(params[k]) for k in
                     ("g1", "b1", "g2", "b2", "g3", "b3",
                      "gsc", "bsc", "gse1", "bse1", "gse2", "bse2")])  # (12, P)

    return dict(w1c=w1c, w3f=w3f, wtap=wtap, hmask=hmask,
                fe=fe, repe=repe, fo=fo, repo=repo, pool=pool, bnp=bnp,
                wse1=params["wse1"].astype(f32),
                wse2=params["wse2"].astype(f32))


def mobilenetv3_block(x_nchw, consts, *, stride=1):
    assert stride == 1, "only the stride==1 (residual) path is implemented"
    N, Cin, H, W = x_nchw.shape
    WCe, Ce = consts["fe"].shape
    WCout, Cout = consts["fo"].shape
    K = consts["hmask"].shape[1]
    NH = N * H

    # NCHW -> lane-folded (N*H, W*Cin) bf16 slab (LHS of the fused conv1).
    xf = jnp.transpose(x_nchw, (0, 2, 3, 1)).reshape(NH, W * Cin).astype(jnp.bfloat16)

    args = (xf, consts["w1c"], consts["w3f"], consts["wtap"], consts["hmask"],
            consts["fe"], consts["repe"], consts["fo"], consts["repo"],
            consts["pool"], consts["bnp"], consts["wse1"], consts["wse2"])

    flops = 2 * NH * (W * Cin) * (W * (Ce + Cout))       # fused conv1 + shortcut
    flops += 2 * K * K * NH * WCe                        # depthwise (VPU MAC)
    flops += 2 * NH * WCe * WCout                        # conv3
    flops += 16 * NH * (WCe + WCout)                     # BN / SE glue
    bytes_accessed = sum(int(a.size) * a.dtype.itemsize for a in args)
    bytes_accessed += NH * WCout * 4

    out_fold = pl.pallas_call(
        _block_kernel,
        out_shape=jax.ShapeDtypeStruct((NH, WCout), jnp.float32),
        cost_estimate=pl.CostEstimate(flops=int(flops), transcendentals=256,
                                      bytes_accessed=int(bytes_accessed)),
    )(*args)

    out_nhwc = out_fold.reshape(N, H, W, Cout)
    return jnp.transpose(out_nhwc, (0, 3, 1, 2))                     # NHWC -> NCHW


def reference(x_nchw, p, *, kernel_size=3):
    """Pure-JAX f32 reference (unfolded NHWC layout), matching the PyTorch
    Block forward: bn1->hswish, dw->bn2, SE, hswish, conv3->bn3, + conv+BN
    shortcut."""
    x = jnp.transpose(x_nchw, (0, 2, 3, 1)).astype(jnp.float32)
    N, H, W, Cin = x.shape
    Ce = p["w1"].shape[1]
    Cout = p["w3"].shape[1]
    K = kernel_size
    pad = K // 2
    M = N * H * W
    xf = x.reshape(M, Cin)
    o1 = _hswish(_bn_rows(xf @ p["w1"], p["g1"], p["b1"])).reshape(N, H, W, Ce)
    xp = jnp.pad(o1, ((0, 0), (pad, pad), (pad, pad), (0, 0)))
    acc = jnp.zeros((N, H, W, Ce), jnp.float32)
    for dy in range(K):
        for dx in range(K):
            acc = acc + xp[:, dy:dy + H, dx:dx + W, :] * p["wdw"][dy * K + dx].reshape(1, 1, 1, Ce)
    o2 = _bn_rows(acc.reshape(M, Ce), p["g2"], p["b2"]).reshape(N, H * W, Ce)
    pooled = jnp.mean(o2, axis=1)
    s = jnp.maximum(_bn_rows(pooled @ p["wse1"], p["gse1"], p["bse1"]), 0.0)
    s = _hsigmoid(_bn_rows(s @ p["wse2"], p["gse2"], p["bse2"]))
    o2 = _hswish(o2 * s[:, None, :]).reshape(M, Ce)
    o3 = _bn_rows(o2 @ p["w3"], p["g3"], p["b3"])
    scut = _bn_rows(xf @ p["wsc"], p["gsc"], p["bsc"])
    out = (o3 + scut).reshape(N, H, W, Cout)
    return jnp.transpose(out, (0, 3, 1, 2))


def make_params(key, in_size, expand_size, out_size, kernel_size, reduction=4):
    cse = expand_size // reduction
    ks = jax.random.split(key, 16)
    n = lambda k, shape, s=0.1: (s * jax.random.normal(k, shape)).astype(jnp.float32)
    gamma = lambda k, c: (1.0 + 0.1 * jax.random.normal(k, (1, c))).astype(jnp.float32)
    beta = lambda k, c: (0.1 * jax.random.normal(k, (1, c))).astype(jnp.float32)
    return {
        "w1":  n(ks[0], (in_size, expand_size), 0.5),
        "g1":  gamma(ks[1], expand_size), "b1": beta(ks[2], expand_size),
        "wdw": n(ks[3], (kernel_size * kernel_size, expand_size), 0.5),
        "g2":  gamma(ks[4], expand_size), "b2": beta(ks[5], expand_size),
        "wse1": n(ks[6], (expand_size, cse), 0.5),
        "gse1": gamma(ks[7], cse), "bse1": beta(ks[7], cse),
        "wse2": n(ks[8], (cse, expand_size), 0.5),
        "gse2": gamma(ks[9], expand_size), "bse2": beta(ks[9], expand_size),
        "w3":  n(ks[10], (expand_size, out_size), 0.5),
        "g3":  gamma(ks[11], out_size), "b3": beta(ks[12], out_size),
        "wsc": n(ks[13], (in_size, out_size), 0.5),
        "gsc": gamma(ks[14], out_size), "bsc": beta(ks[15], out_size),
    }


if __name__ == "__main__":
    # Block(kernel_size=3, in_size=4, expand_size=16, out_size=8,
    #       nolinear=hswish, semodule=SeModule(16), stride=1)
    N, Cin, H, W = 2, 4, 16, 16
    Ce, Cout, K = 16, 8, 3

    key = jax.random.PRNGKey(0)
    kx, kp = jax.random.split(key)
    x = jax.random.normal(kx, (N, Cin, H, W), dtype=jnp.float32)  # NCHW like PyTorch
    params = make_params(kp, Cin, Ce, Cout, K)

    # Constant operands built once (hoisted out of the per-call path).
    consts = make_block_constants(params, batch=N, height=H, width=W, kernel_size=K)

    out = jax.block_until_ready(mobilenetv3_block(x, params and consts))
    ref = jax.block_until_ready(reference(x, params, kernel_size=K))

    assert out.shape == (N, Cout, H, W), out.shape
    max_err = float(jnp.max(jnp.abs(out - ref)))
    # conv1/shortcut/conv3 run with bf16 MXU operands (f32 accumulation) against
    # an all-f32 reference, so allow a looser absolute tolerance; the all-f32
    # variant of this kernel matches the reference to < 1e-2.
    assert max_err < 1e-1, f"max abs err {max_err}"
    print("KERNEL_OK")
</pallas_src>

<mosaic_0001>
module attributes {stable_mosaic.version = 11 : i64} {
  func.func @_block_kernel(%arg0: memref<32x64xbf16, #tpu.memory_space<vmem>>, %arg1: memref<64x384xbf16, #tpu.memory_space<vmem>>, %arg2: memref<256x128xbf16, #tpu.memory_space<vmem>>, %arg3: memref<9x256xf32, #tpu.memory_space<vmem>>, %arg4: memref<32x3xf32, #tpu.memory_space<vmem>>, %arg5: memref<256x16xf32, #tpu.memory_space<vmem>>, %arg6: memref<16x256xf32, #tpu.memory_space<vmem>>, %arg7: memref<128x8xf32, #tpu.memory_space<vmem>>, %arg8: memref<8x128xf32, #tpu.memory_space<vmem>>, %arg9: memref<2x32xf32, #tpu.memory_space<vmem>>, %arg10: memref<12x16xf32, #tpu.memory_space<vmem>>, %arg11: memref<16x4xf32, #tpu.memory_space<vmem>>, %arg12: memref<4x16xf32, #tpu.memory_space<vmem>>, %arg13: memref<32x128xf32, #tpu.memory_space<vmem>>) attributes {dimension_semantics = [], scalar_prefetch = 0 : i64, scratch_operands = 0 : i64, tpu.core_type = #tpu.core_type<tc>} {
    %c0 = arith.constant 0 : index
    %c0_0 = arith.constant 0 : index
    %0 = vector.load %arg10[%c0, %c0_0] : memref<12x16xf32, #tpu.memory_space<vmem>>, vector<1x16xf32>
    %c1 = arith.constant 1 : index
    %c0_1 = arith.constant 0 : index
    %1 = vector.load %arg10[%c1, %c0_1] : memref<12x16xf32, #tpu.memory_space<vmem>>, vector<1x16xf32>
    %c2 = arith.constant 2 : index
    %c0_2 = arith.constant 0 : index
    %2 = vector.load %arg10[%c2, %c0_2] : memref<12x16xf32, #tpu.memory_space<vmem>>, vector<1x16xf32>
    %c3 = arith.constant 3 : index
    %c0_3 = arith.constant 0 : index
    %3 = vector.load %arg10[%c3, %c0_3] : memref<12x16xf32, #tpu.memory_space<vmem>>, vector<1x16xf32>
    %c4 = arith.constant 4 : index
    %c0_4 = arith.constant 0 : index
    %4 = vector.load %arg10[%c4, %c0_4] : memref<12x16xf32, #tpu.memory_space<vmem>>, vector<1x8xf32>
    %c5 = arith.constant 5 : index
    %c0_5 = arith.constant 0 : index
    %5 = vector.load %arg10[%c5, %c0_5] : memref<12x16xf32, #tpu.memory_space<vmem>>, vector<1x8xf32>
    %c6 = arith.constant 6 : index
    %c0_6 = arith.constant 0 : index
    %6 = vector.load %arg10[%c6, %c0_6] : memref<12x16xf32, #tpu.memory_space<vmem>>, vector<1x8xf32>
    %c7 = arith.constant 7 : index
    %c0_7 = arith.constant 0 : index
    %7 = vector.load %arg10[%c7, %c0_7] : memref<12x16xf32, #tpu.memory_space<vmem>>, vector<1x8xf32>
    %c8 = arith.constant 8 : index
    %c0_8 = arith.constant 0 : index
    %8 = vector.load %arg10[%c8, %c0_8] : memref<12x16xf32, #tpu.memory_space<vmem>>, vector<1x4xf32>
    %c9 = arith.constant 9 : index
    %c0_9 = arith.constant 0 : index
    %9 = vector.load %arg10[%c9, %c0_9] : memref<12x16xf32, #tpu.memory_space<vmem>>, vector<1x4xf32>
    %c10 = arith.constant 10 : index
    %c0_10 = arith.constant 0 : index
    %10 = vector.load %arg10[%c10, %c0_10] : memref<12x16xf32, #tpu.memory_space<vmem>>, vector<1x16xf32>
    %c11 = arith.constant 11 : index
    %c0_11 = arith.constant 0 : index
    %11 = vector.load %arg10[%c11, %c0_11] : memref<12x16xf32, #tpu.memory_space<vmem>>, vector<1x16xf32>
    %c0_12 = arith.constant 0 : index
    %c0_13 = arith.constant 0 : index
    %12 = vector.load %arg0[%c0_12, %c0_13] : memref<32x64xbf16, #tpu.memory_space<vmem>>, vector<32x64xbf16>
    %c0_14 = arith.constant 0 : index
    %c0_15 = arith.constant 0 : index
    %13 = vector.load %arg1[%c0_14, %c0_15] : memref<64x384xbf16, #tpu.memory_space<vmem>>, vector<64x384xbf16>
    %cst = arith.constant dense<0.000000e+00> : vector<32x384xf32>
    %14 = tpu.matmul %12, %13, %cst {dimension_numbers = #tpu.dot_dimension_numbers<[1], [0], [0], [1], [0, 0, 1, 1], [], []>} : vector<32x64xbf16>, vector<64x384xbf16>, vector<32x384xf32> -> vector<32x384xf32>
    %15 = vector.extract_strided_slice %14 {offsets = [0, 0], sizes = [32, 256], strides = [1, 1]} : vector<32x384xf32> to vector<32x256xf32>
    %16 = vector.extract_strided_slice %14 {offsets = [0, 256], sizes = [32, 128], strides = [1, 1]} : vector<32x384xf32> to vector<32x128xf32>
    %c0_16 = arith.constant 0 : index
    %c0_17 = arith.constant 0 : index
    %17 = vector.load %arg5[%c0_16, %c0_17] : memref<256x16xf32, #tpu.memory_space<vmem>>, vector<256x16xf32>
    %c0_18 = arith.constant 0 : index
    %c0_19 = arith.constant 0 : index
    %18 = vector.load %arg6[%c0_18, %c0_19] : memref<16x256xf32, #tpu.memory_space<vmem>>, vector<16x256xf32>
    %cst_20 = arith.constant dense<0.000000e+00> : vector<256xf32>
    %19 = vector.multi_reduction <add>, %15, %cst_20 [0] : vector<32x256xf32> to vector<256xf32>
    %20 = vector.shape_cast %19 : vector<256xf32> to vector<1x256xf32>
    %cst_21 = arith.constant dense<0.000000e+00> : vector<1x16xf32>
    %21 = tpu.matmul %20, %17, %cst_21 {dimension_numbers = #tpu.dot_dimension_numbers<[1], [0], [0], [1], [0, 0, 1, 1], [], []>} : vector<1x256xf32>, vector<256x16xf32>, vector<1x16xf32> -> vector<1x16xf32>
    %22 = arith.mulf %15, %15 : vector<32x256xf32>
    %cst_22 = arith.constant dense<0.000000e+00> : vector<256xf32>
    %23 = vector.multi_reduction <add>, %22, %cst_22 [0] : vector<32x256xf32> to vector<256xf32>
    %24 = vector.shape_cast %23 : vector<256xf32> to vector<1x256xf32>
    %cst_23 = arith.constant dense<0.000000e+00> : vector<1x16xf32>
    %25 = tpu.matmul %24, %17, %cst_23 {dimension_numbers = #tpu.dot_dimension_numbers<[1], [0], [0], [1], [0, 0, 1, 1], [], []>} : vector<1x256xf32>, vector<256x16xf32>, vector<1x16xf32> -> vector<1x16xf32>
    %cst_24 = arith.constant 0.001953125 : f32
    %26 = vector.broadcast %cst_24 : f32 to vector<1x16xf32>
    %27 = arith.mulf %21, %26 : vector<1x16xf32>
    %cst_25 = arith.constant 0.001953125 : f32
    %28 = vector.broadcast %cst_25 : f32 to vector<1x16xf32>
    %29 = arith.mulf %25, %28 : vector<1x16xf32>
    %30 = arith.mulf %27, %27 : vector<1x16xf32>
    %31 = arith.subf %29, %30 : vector<1x16xf32>
    %cst_26 = arith.constant 9.99999974E-6 : f32
    %32 = vector.broadcast %cst_26 : f32 to vector<1x16xf32>
    %33 = arith.addf %31, %32 : vector<1x16xf32>
    %34 = math.rsqrt %33 : vector<1x16xf32>
    %35 = arith.mulf %0, %34 : vector<1x16xf32>
    %36 = arith.mulf %27, %35 : vector<1x16xf32>
    %37 = arith.subf %1, %36 : vector<1x16xf32>
    %cst_27 = arith.constant dense<0.000000e+00> : vector<1x256xf32>
    %38 = tpu.matmul %35, %18, %cst_27 {dimension_numbers = #tpu.dot_dimension_numbers<[1], [0], [0], [1], [0, 0, 1, 1], [], []>} : vector<1x16xf32>, vector<16x256xf32>, vector<1x256xf32> -> vector<1x256xf32>
    %cst_28 = arith.constant dense<0.000000e+00> : vector<1x256xf32>
    %39 = tpu.matmul %37, %18, %cst_28 {dimension_numbers = #tpu.dot_dimension_numbers<[1], [0], [0], [1], [0, 0, 1, 1], [], []>} : vector<1x16xf32>, vector<16x256xf32>, vector<1x256xf32> -> vector<1x256xf32>
    %40 = vector.broadcast %38 : vector<1x256xf32> to vector<32x256xf32>
    %41 = arith.mulf %15, %40 : vector<32x256xf32>
    %42 = vector.broadcast %39 : vector<1x256xf32> to vector<32x256xf32>
    %43 = arith.addf %41, %42 : vector<32x256xf32>
    %cst_29 = arith.constant 3.000000e+00 : f32
    %44 = vector.broadcast %cst_29 : f32 to vector<32x256xf32>
    %45 = arith.addf %43, %44 : vector<32x256xf32>
    %cst_30 = arith.constant 0.000000e+00 : f32
    %cst_31 = arith.constant 6.000000e+00 : f32
    %46 = vector.broadcast %cst_30 : f32 to vector<32x256xf32>
    %47 = arith.maximumf %46, %45 : vector<32x256xf32>
    %48 = vector.broadcast %cst_31 : f32 to vector<32x256xf32>
    %49 = arith.minimumf %48, %47 : vector<32x256xf32>
    %50 = arith.mulf %43, %49 : vector<32x256xf32>
    %cst_32 = arith.constant 0.166666672 : f32
    %51 = vector.broadcast %cst_32 : f32 to vector<32x256xf32>
    %52 = arith.mulf %50, %51 : vector<32x256xf32>
    %c4_33 = arith.constant 4 : index
    %c0_34 = arith.constant 0 : index
    %53 = vector.load %arg3[%c4_33, %c0_34] : memref<9x256xf32, #tpu.memory_space<vmem>>, vector<1x256xf32>
    %54 = vector.broadcast %53 : vector<1x256xf32> to vector<32x256xf32>
    %55 = arith.mulf %52, %54 : vector<32x256xf32>
    %c1_i32 = arith.constant 1 : i32
    %56 = tpu.dynamic_rotate %52 by %c1_i32 dim 0 : vector<32x256xf32>, i32 -> vector<32x256xf32>
    %c0_35 = arith.constant 0 : index
    %c0_36 = arith.constant 0 : index
    %57 = vector.load %arg4[%c0_35, %c0_36] : memref<32x3xf32, #tpu.memory_space<vmem>>, vector<32x1xf32>
    %58 = vector.broadcast %57 : vector<32x1xf32> to vector<32x256xf32>
    %59 = arith.mulf %56, %58 : vector<32x256xf32>
    %c16_i32 = arith.constant 16 : i32
    %60 = tpu.dynamic_rotate %59 by %c16_i32 dim 1 : vector<32x256xf32>, i32 -> vector<32x256xf32>
    %c0_37 = arith.constant 0 : index
    %c0_38 = arith.constant 0 : index
    %61 = vector.load %arg3[%c0_37, %c0_38] : memref<9x256xf32, #tpu.memory_space<vmem>>, vector<1x256xf32>
    %62 = vector.broadcast %61 : vector<1x256xf32> to vector<32x256xf32>
    %63 = arith.mulf %60, %62 : vector<32x256xf32>
    %64 = arith.addf %55, %63 : vector<32x256xf32>
    %c1_39 = arith.constant 1 : index
    %c0_40 = arith.constant 0 : index
    %65 = vector.load %arg3[%c1_39, %c0_40] : memref<9x256xf32, #tpu.memory_space<vmem>>, vector<1x256xf32>
    %66 = vector.broadcast %65 : vector<1x256xf32> to vector<32x256xf32>
    %67 = arith.mulf %59, %66 : vector<32x256xf32>
    %68 = arith.addf %64, %67 : vector<32x256xf32>
    %c240_i32 = arith.constant 240 : i32
    %69 = tpu.dynamic_rotate %59 by %c240_i32 dim 1 : vector<32x256xf32>, i32 -> vector<32x256xf32>
    %c2_41 = arith.constant 2 : index
    %c0_42 = arith.constant 0 : index
    %70 = vector.load %arg3[%c2_41, %c0_42] : memref<9x256xf32, #tpu.memory_space<vmem>>, vector<1x256xf32>
    %71 = vector.broadcast %70 : vector<1x256xf32> to vector<32x256xf32>
    %72 = arith.mulf %69, %71 : vector<32x256xf32>
    %73 = arith.addf %68, %72 : vector<32x256xf32>
    %c16_i32_43 = arith.constant 16 : i32
    %74 = tpu.dynamic_rotate %52 by %c16_i32_43 dim 1 : vector<32x256xf32>, i32 -> vector<32x256xf32>
    %c3_44 = arith.constant 3 : index
    %c0_45 = arith.constant 0 : index
    %75 = vector.load %arg3[%c3_44, %c0_45] : memref<9x256xf32, #tpu.memory_space<vmem>>, vector<1x256xf32>
    %76 = vector.broadcast %75 : vector<1x256xf32> to vector<32x256xf32>
    %77 = arith.mulf %74, %76 : vector<32x256xf32>
    %78 = arith.addf %73, %77 : vector<32x256xf32>
    %c240_i32_46 = arith.constant 240 : i32
    %79 = tpu.dynamic_rotate %52 by %c240_i32_46 dim 1 : vector<32x256xf32>, i32 -> vector<32x256xf32>
    %c5_47 = arith.constant 5 : index
    %c0_48 = arith.constant 0 : index
    %80 = vector.load %arg3[%c5_47, %c0_48] : memref<9x256xf32, #tpu.memory_space<vmem>>, vector<1x256xf32>
    %81 = vector.broadcast %80 : vector<1x256xf32> to vector<32x256xf32>
    %82 = arith.mulf %79, %81 : vector<32x256xf32>
    %83 = arith.addf %78, %82 : vector<32x256xf32>
    %c31_i32 = arith.constant 31 : i32
    %84 = tpu.dynamic_rotate %52 by %c31_i32 dim 0 : vector<32x256xf32>, i32 -> vector<32x256xf32>
    %c0_49 = arith.constant 0 : index
    %c2_50 = arith.constant 2 : index
    %85 = vector.load %arg4[%c0_49, %c2_50] : memref<32x3xf32, #tpu.memory_space<vmem>>, vector<32x1xf32>
    %86 = vector.broadcast %85 : vector<32x1xf32> to vector<32x256xf32>
    %87 = arith.mulf %84, %86 : vector<32x256xf32>
    %c16_i32_51 = arith.constant 16 : i32
    %88 = tpu.dynamic_rotate %87 by %c16_i32_51 dim 1 : vector<32x256xf32>, i32 -> vector<32x256xf32>
    %c6_52 = arith.constant 6 : index
    %c0_53 = arith.constant 0 : index
    %89 = vector.load %arg3[%c6_52, %c0_53] : memref<9x256xf32, #tpu.memory_space<vmem>>, vector<1x256xf32>
    %90 = vector.broadcast %89 : vector<1x256xf32> to vector<32x256xf32>
    %91 = arith.mulf %88, %90 : vector<32x256xf32>
    %92 = arith.addf %83, %91 : vector<32x256xf32>
    %c7_54 = arith.constant 7 : index
    %c0_55 = arith.constant 0 : index
    %93 = vector.load %arg3[%c7_54, %c0_55] : memref<9x256xf32, #tpu.memory_space<vmem>>, vector<1x256xf32>
    %94 = vector.broadcast %93 : vector<1x256xf32> to vector<32x256xf32>
    %95 = arith.mulf %87, %94 : vector<32x256xf32>
    %96 = arith.addf %92, %95 : vector<32x256xf32>
    %c240_i32_56 = arith.constant 240 : i32
    %97 = tpu.dynamic_rotate %87 by %c240_i32_56 dim 1 : vector<32x256xf32>, i32 -> vector<32x256xf32>
    %c8_57 = arith.constant 8 : index
    %c0_58 = arith.constant 0 : index
    %98 = vector.load %arg3[%c8_57, %c0_58] : memref<9x256xf32, #tpu.memory_space<vmem>>, vector<1x256xf32>
    %99 = vector.broadcast %98 : vector<1x256xf32> to vector<32x256xf32>
    %100 = arith.mulf %97, %99 : vector<32x256xf32>
    %101 = arith.addf %96, %100 : vector<32x256xf32>
    %c0_59 = arith.constant 0 : index
    %c0_60 = arith.constant 0 : index
    %102 = vector.load %arg5[%c0_59, %c0_60] : memref<256x16xf32, #tpu.memory_space<vmem>>, vector<256x16xf32>
    %c0_61 = arith.constant 0 : index
    %c0_62 = arith.constant 0 : index
    %103 = vector.load %arg6[%c0_61, %c0_62] : memref<16x256xf32, #tpu.memory_space<vmem>>, vector<16x256xf32>
    %cst_63 = arith.constant dense<0.000000e+00> : vector<256xf32>
    %104 = vector.multi_reduction <add>, %101, %cst_63 [0] : vector<32x256xf32> to vector<256xf32>
    %105 = vector.shape_cast %104 : vector<256xf32> to vector<1x256xf32>
    %cst_64 = arith.constant dense<0.000000e+00> : vector<1x16xf32>
    %106 = tpu.matmul %105, %102, %cst_64 {dimension_numbers = #tpu.dot_dimension_numbers<[1], [0], [0], [1], [0, 0, 1, 1], [], []>} : vector<1x256xf32>, vector<256x16xf32>, vector<1x16xf32> -> vector<1x16xf32>
    %107 = arith.mulf %101, %101 : vector<32x256xf32>
    %cst_65 = arith.constant dense<0.000000e+00> : vector<256xf32>
    %108 = vector.multi_reduction <add>, %107, %cst_65 [0] : vector<32x256xf32> to vector<256xf32>
    %109 = vector.shape_cast %108 : vector<256xf32> to vector<1x256xf32>
    %cst_66 = arith.constant dense<0.000000e+00> : vector<1x16xf32>
    %110 = tpu.matmul %109, %102, %cst_66 {dimension_numbers = #tpu.dot_dimension_numbers<[1], [0], [0], [1], [0, 0, 1, 1], [], []>} : vector<1x256xf32>, vector<256x16xf32>, vector<1x16xf32> -> vector<1x16xf32>
    %cst_67 = arith.constant 0.001953125 : f32
    %111 = vector.broadcast %cst_67 : f32 to vector<1x16xf32>
    %112 = arith.mulf %106, %111 : vector<1x16xf32>
    %cst_68 = arith.constant 0.001953125 : f32
    %113 = vector.broadcast %cst_68 : f32 to vector<1x16xf32>
    %114 = arith.mulf %110, %113 : vector<1x16xf32>
    %115 = arith.mulf %112, %112 : vector<1x16xf32>
    %116 = arith.subf %114, %115 : vector<1x16xf32>
    %cst_69 = arith.constant 9.99999974E-6 : f32
    %117 = vector.broadcast %cst_69 : f32 to vector<1x16xf32>
    %118 = arith.addf %116, %117 : vector<1x16xf32>
    %119 = math.rsqrt %118 : vector<1x16xf32>
    %120 = arith.mulf %2, %119 : vector<1x16xf32>
    %121 = arith.mulf %112, %120 : vector<1x16xf32>
    %122 = arith.subf %3, %121 : vector<1x16xf32>
    %cst_70 = arith.constant dense<0.000000e+00> : vector<1x256xf32>
    %123 = tpu.matmul %120, %103, %cst_70 {dimension_numbers = #tpu.dot_dimension_numbers<[1], [0], [0], [1], [0, 0, 1, 1], [], []>} : vector<1x16xf32>, vector<16x256xf32>, vector<1x256xf32> -> vector<1x256xf32>
    %cst_71 = arith.constant dense<0.000000e+00> : vector<1x256xf32>
    %124 = tpu.matmul %122, %103, %cst_71 {dimension_numbers = #tpu.dot_dimension_numbers<[1], [0], [0], [1], [0, 0, 1, 1], [], []>} : vector<1x16xf32>, vector<16x256xf32>, vector<1x256xf32> -> vector<1x256xf32>
    %125 = vector.broadcast %123 : vector<1x256xf32> to vector<32x256xf32>
    %126 = arith.mulf %101, %125 : vector<32x256xf32>
    %127 = vector.broadcast %124 : vector<1x256xf32> to vector<32x256xf32>
    %128 = arith.addf %126, %127 : vector<32x256xf32>
    %c0_72 = arith.constant 0 : index
    %c0_73 = arith.constant 0 : index
    %129 = vector.load %arg9[%c0_72, %c0_73] : memref<2x32xf32, #tpu.memory_space<vmem>>, vector<2x32xf32>
    %cst_74 = arith.constant dense<0.000000e+00> : vector<2x256xf32>
    %130 = tpu.matmul %129, %128, %cst_74 {dimension_numbers = #tpu.dot_dimension_numbers<[1], [0], [0], [1], [0, 0, 1, 1], [], []>} : vector<2x32xf32>, vector<32x256xf32>, vector<2x256xf32> -> vector<2x256xf32>
    %c0_75 = arith.constant 0 : index
    %c0_76 = arith.constant 0 : index
    %131 = vector.load %arg5[%c0_75, %c0_76] : memref<256x16xf32, #tpu.memory_space<vmem>>, vector<256x16xf32>
    %cst_77 = arith.constant dense<0.000000e+00> : vector<2x16xf32>
    %132 = tpu.matmul %130, %131, %cst_77 {dimension_numbers = #tpu.dot_dimension_numbers<[1], [0], [0], [1], [0, 0, 1, 1], [], []>} : vector<2x256xf32>, vector<256x16xf32>, vector<2x16xf32> -> vector<2x16xf32>
    %cst_78 = arith.constant 3.906250e-03 : f32
    %133 = vector.broadcast %cst_78 : f32 to vector<2x16xf32>
    %134 = arith.mulf %132, %133 : vector<2x16xf32>
    %c0_79 = arith.constant 0 : index
    %c0_80 = arith.constant 0 : index
    %135 = vector.load %arg11[%c0_79, %c0_80] : memref<16x4xf32, #tpu.memory_space<vmem>>, vector<16x4xf32>
    %cst_81 = arith.constant dense<0.000000e+00> : vector<2x4xf32>
    %136 = tpu.matmul %134, %135, %cst_81 {dimension_numbers = #tpu.dot_dimension_numbers<[1], [0], [0], [1], [0, 0, 1, 1], [], []>} : vector<2x16xf32>, vector<16x4xf32>, vector<2x4xf32> -> vector<2x4xf32>
    %cst_82 = arith.constant dense<0.000000e+00> : vector<4xf32>
    %137 = vector.multi_reduction <add>, %136, %cst_82 [0] : vector<2x4xf32> to vector<4xf32>
    %138 = vector.shape_cast %137 : vector<4xf32> to vector<1x4xf32>
    %cst_83 = arith.constant 2.000000e+00 : f32
    %139 = vector.broadcast %cst_83 : f32 to vector<1x4xf32>
    %140 = arith.divf %138, %139 : vector<1x4xf32>
    %141 = arith.mulf %136, %136 : vector<2x4xf32>
    %cst_84 = arith.constant dense<0.000000e+00> : vector<4xf32>
    %142 = vector.multi_reduction <add>, %141, %cst_84 [0] : vector<2x4xf32> to vector<4xf32>
    %143 = vector.shape_cast %142 : vector<4xf32> to vector<1x4xf32>
    %cst_85 = arith.constant 2.000000e+00 : f32
    %144 = vector.broadcast %cst_85 : f32 to vector<1x4xf32>
    %145 = arith.divf %143, %144 : vector<1x4xf32>
    %146 = arith.mulf %140, %140 : vector<1x4xf32>
    %147 = arith.subf %145, %146 : vector<1x4xf32>
    %148 = vector.broadcast %140 : vector<1x4xf32> to vector<2x4xf32>
    %149 = arith.subf %136, %148 : vector<2x4xf32>
    %cst_86 = arith.constant 9.99999974E-6 : f32
    %150 = vector.broadcast %cst_86 : f32 to vector<1x4xf32>
    %151 = arith.addf %147, %150 : vector<1x4xf32>
    %152 = math.rsqrt %151 : vector<1x4xf32>
    %153 = vector.broadcast %152 : vector<1x4xf32> to vector<2x4xf32>
    %154 = arith.mulf %149, %153 : vector<2x4xf32>
    %155 = vector.broadcast %8 : vector<1x4xf32> to vector<2x4xf32>
    %156 = arith.mulf %154, %155 : vector<2x4xf32>
    %157 = vector.broadcast %9 : vector<1x4xf32> to vector<2x4xf32>
    %158 = arith.addf %156, %157 : vector<2x4xf32>
    %cst_87 = arith.constant 0.000000e+00 : f32
    %159 = vector.broadcast %cst_87 : f32 to vector<2x4xf32>
    %160 = arith.maximumf %158, %159 : vector<2x4xf32>
    %c0_88 = arith.constant 0 : index
    %c0_89 = arith.constant 0 : index
    %161 = vector.load %arg12[%c0_88, %c0_89] : memref<4x16xf32, #tpu.memory_space<vmem>>, vector<4x16xf32>
    %cst_90 = arith.constant dense<0.000000e+00> : vector<2x16xf32>
    %162 = tpu.matmul %160, %161, %cst_90 {dimension_numbers = #tpu.dot_dimension_numbers<[1], [0], [0], [1], [0, 0, 1, 1], [], []>} : vector<2x4xf32>, vector<4x16xf32>, vector<2x16xf32> -> vector<2x16xf32>
    %cst_91 = arith.constant dense<0.000000e+00> : vector<16xf32>
    %163 = vector.multi_reduction <add>, %162, %cst_91 [0] : vector<2x16xf32> to vector<16xf32>
    %164 = vector.shape_cast %163 : vector<16xf32> to vector<1x16xf32>
    %cst_92 = arith.constant 2.000000e+00 : f32
    %165 = vector.broadcast %cst_92 : f32 to vector<1x16xf32>
    %166 = arith.divf %164, %165 : vector<1x16xf32>
    %167 = arith.mulf %162, %162 : vector<2x16xf32>
    %cst_93 = arith.constant dense<0.000000e+00> : vector<16xf32>
    %168 = vector.multi_reduction <add>, %167, %cst_93 [0] : vector<2x16xf32> to vector<16xf32>
    %169 = vector.shape_cast %168 : vector<16xf32> to vector<1x16xf32>
    %cst_94 = arith.constant 2.000000e+00 : f32
    %170 = vector.broadcast %cst_94 : f32 to vector<1x16xf32>
    %171 = arith.divf %169, %170 : vector<1x16xf32>
    %172 = arith.mulf %166, %166 : vector<1x16xf32>
    %173 = arith.subf %171, %172 : vector<1x16xf32>
    %174 = vector.broadcast %166 : vector<1x16xf32> to vector<2x16xf32>
    %175 = arith.subf %162, %174 : vector<2x16xf32>
    %cst_95 = arith.constant 9.99999974E-6 : f32
    %176 = vector.broadcast %cst_95 : f32 to vector<1x16xf32>
    %177 = arith.addf %173, %176 : vector<1x16xf32>
    %178 = math.rsqrt %177 : vector<1x16xf32>
    %179 = vector.broadcast %178 : vector<1x16xf32> to vector<2x16xf32>
    %180 = arith.mulf %175, %179 : vector<2x16xf32>
    %181 = vector.broadcast %10 : vector<1x16xf32> to vector<2x16xf32>
    %182 = arith.mulf %180, %181 : vector<2x16xf32>
    %183 = vector.broadcast %11 : vector<1x16xf32> to vector<2x16xf32>
    %184 = arith.addf %182, %183 : vector<2x16xf32>
    %cst_96 = arith.constant 3.000000e+00 : f32
    %185 = vector.broadcast %cst_96 : f32 to vector<2x16xf32>
    %186 = arith.addf %184, %185 : vector<2x16xf32>
    %cst_97 = arith.constant 0.000000e+00 : f32
    %cst_98 = arith.constant 6.000000e+00 : f32
    %187 = vector.broadcast %cst_97 : f32 to vector<2x16xf32>
    %188 = arith.maximumf %187, %186 : vector<2x16xf32>
    %189 = vector.broadcast %cst_98 : f32 to vector<2x16xf32>
    %190 = arith.minimumf %189, %188 : vector<2x16xf32>
    %cst_99 = arith.constant 0.166666672 : f32
    %191 = vector.broadcast %cst_99 : f32 to vector<2x16xf32>
    %192 = arith.mulf %190, %191 : vector<2x16xf32>
    %c0_100 = arith.constant 0 : index
    %c0_101 = arith.constant 0 : index
    %193 = vector.load %arg6[%c0_100, %c0_101] : memref<16x256xf32, #tpu.memory_space<vmem>>, vector<16x256xf32>
    %cst_102 = arith.constant dense<0.000000e+00> : vector<2x256xf32>
    %194 = tpu.matmul %192, %193, %cst_102 {dimension_numbers = #tpu.dot_dimension_numbers<[1], [0], [0], [1], [0, 0, 1, 1], [], []>} : vector<2x16xf32>, vector<16x256xf32>, vector<2x256xf32> -> vector<2x256xf32>
    %195 = vector.extract_strided_slice %128 {offsets = [0, 0], sizes = [16, 256], strides = [1, 1]} : vector<32x256xf32> to vector<16x256xf32>
    %196 = vector.extract_strided_slice %194 {offsets = [0, 0], sizes = [1, 256], strides = [1, 1]} : vector<2x256xf32> to vector<1x256xf32>
    %197 = vector.broadcast %196 : vector<1x256xf32> to vector<16x256xf32>
    %198 = arith.mulf %195, %197 : vector<16x256xf32>
    %199 = vector.extract_strided_slice %128 {offsets = [16, 0], sizes = [16, 256], strides = [1, 1]} : vector<32x256xf32> to vector<16x256xf32>
    %200 = vector.extract_strided_slice %194 {offsets = [1, 0], sizes = [1, 256], strides = [1, 1]} : vector<2x256xf32> to vector<1x256xf32>
    %201 = vector.broadcast %200 : vector<1x256xf32> to vector<16x256xf32>
    %202 = arith.mulf %199, %201 : vector<16x256xf32>
    %203 = tpu.concatenate %198, %202 in 0 : vector<16x256xf32>, vector<16x256xf32> -> vector<32x256xf32>
    %cst_103 = arith.constant 3.000000e+00 : f32
    %204 = vector.broadcast %cst_103 : f32 to vector<32x256xf32>
    %205 = arith.addf %203, %204 : vector<32x256xf32>
    %cst_104 = arith.constant 0.000000e+00 : f32
    %cst_105 = arith.constant 6.000000e+00 : f32
    %206 = vector.broadcast %cst_104 : f32 to vector<32x256xf32>
    %207 = arith.maximumf %206, %205 : vector<32x256xf32>
    %208 = vector.broadcast %cst_105 : f32 to vector<32x256xf32>
    %209 = arith.minimumf %208, %207 : vector<32x256xf32>
    %210 = arith.mulf %203, %209 : vector<32x256xf32>
    %cst_106 = arith.constant 0.166666672 : f32
    %211 = vector.broadcast %cst_106 : f32 to vector<32x256xf32>
    %212 = arith.mulf %210, %211 : vector<32x256xf32>
    %213 = arith.truncf %212 : vector<32x256xf32> to vector<32x256xbf16>
    %c0_107 = arith.constant 0 : index
    %c0_108 = arith.constant 0 : index
    %214 = vector.load %arg2[%c0_107, %c0_108] : memref<256x128xbf16, #tpu.memory_space<vmem>>, vector<256x128xbf16>
    %cst_109 = arith.constant dense<0.000000e+00> : vector<32x128xf32>
    %215 = tpu.matmul %213, %214, %cst_109 {dimension_numbers = #tpu.dot_dimension_numbers<[1], [0], [0], [1], [0, 0, 1, 1], [], []>} : vector<32x256xbf16>, vector<256x128xbf16>, vector<32x128xf32> -> vector<32x128xf32>
    %c0_110 = arith.constant 0 : index
    %c0_111 = arith.constant 0 : index
    %216 = vector.load %arg7[%c0_110, %c0_111] : memref<128x8xf32, #tpu.memory_space<vmem>>, vector<128x8xf32>
    %c0_112 = arith.constant 0 : index
    %c0_113 = arith.constant 0 : index
    %217 = vector.load %arg8[%c0_112, %c0_113] : memref<8x128xf32, #tpu.memory_space<vmem>>, vector<8x128xf32>
    %cst_114 = arith.constant dense<0.000000e+00> : vector<128xf32>
    %218 = vector.multi_reduction <add>, %215, %cst_114 [0] : vector<32x128xf32> to vector<128xf32>
    %219 = vector.shape_cast %218 : vector<128xf32> to vector<1x128xf32>
    %cst_115 = arith.constant dense<0.000000e+00> : vector<1x8xf32>
    %220 = tpu.matmul %219, %216, %cst_115 {dimension_numbers = #tpu.dot_dimension_numbers<[1], [0], [0], [1], [0, 0, 1, 1], [], []>} : vector<1x128xf32>, vector<128x8xf32>, vector<1x8xf32> -> vector<1x8xf32>
    %221 = arith.mulf %215, %215 : vector<32x128xf32>
    %cst_116 = arith.constant dense<0.000000e+00> : vector<128xf32>
    %222 = vector.multi_reduction <add>, %221, %cst_116 [0] : vector<32x128xf32> to vector<128xf32>
    %223 = vector.shape_cast %222 : vector<128xf32> to vector<1x128xf32>
    %cst_117 = arith.constant dense<0.000000e+00> : vector<1x8xf32>
    %224 = tpu.matmul %223, %216, %cst_117 {dimension_numbers = #tpu.dot_dimension_numbers<[1], [0], [0], [1], [0, 0, 1, 1], [], []>} : vector<1x128xf32>, vector<128x8xf32>, vector<1x8xf32> -> vector<1x8xf32>
    %cst_118 = arith.constant 0.001953125 : f32
    %225 = vector.broadcast %cst_118 : f32 to vector<1x8xf32>
    %226 = arith.mulf %220, %225 : vector<1x8xf32>
    %cst_119 = arith.constant 0.001953125 : f32
    %227 = vector.broadcast %cst_119 : f32 to vector<1x8xf32>
    %228 = arith.mulf %224, %227 : vector<1x8xf32>
    %229 = arith.mulf %226, %226 : vector<1x8xf32>
    %230 = arith.subf %228, %229 : vector<1x8xf32>
    %cst_120 = arith.constant 9.99999974E-6 : f32
    %231 = vector.broadcast %cst_120 : f32 to vector<1x8xf32>
    %232 = arith.addf %230, %231 : vector<1x8xf32>
    %233 = math.rsqrt %232 : vector<1x8xf32>
    %234 = arith.mulf %4, %233 : vector<1x8xf32>
    %235 = arith.mulf %226, %234 : vector<1x8xf32>
    %236 = arith.subf %5, %235 : vector<1x8xf32>
    %cst_121 = arith.constant dense<0.000000e+00> : vector<1x128xf32>
    %237 = tpu.matmul %234, %217, %cst_121 {dimension_numbers = #tpu.dot_dimension_numbers<[1], [0], [0], [1], [0, 0, 1, 1], [], []>} : vector<1x8xf32>, vector<8x128xf32>, vector<1x128xf32> -> vector<1x128xf32>
    %cst_122 = arith.constant dense<0.000000e+00> : vector<1x128xf32>
    %238 = tpu.matmul %236, %217, %cst_122 {dimension_numbers = #tpu.dot_dimension_numbers<[1], [0], [0], [1], [0, 0, 1, 1], [], []>} : vector<1x8xf32>, vector<8x128xf32>, vector<1x128xf32> -> vector<1x128xf32>
    %239 = vector.broadcast %237 : vector<1x128xf32> to vector<32x128xf32>
    %240 = arith.mulf %215, %239 : vector<32x128xf32>
    %241 = vector.broadcast %238 : vector<1x128xf32> to vector<32x128xf32>
    %242 = arith.addf %240, %241 : vector<32x128xf32>
    %c0_123 = arith.constant 0 : index
    %c0_124 = arith.constant 0 : index
    %243 = vector.load %arg7[%c0_123, %c0_124] : memref<128x8xf32, #tpu.memory_space<vmem>>, vector<128x8xf32>
    %c0_125 = arith.constant 0 : index
    %c0_126 = arith.constant 0 : index
    %244 = vector.load %arg8[%c0_125, %c0_126] : memref<8x128xf32, #tpu.memory_space<vmem>>, vector<8x128xf32>
    %cst_127 = arith.constant dense<0.000000e+00> : vector<128xf32>
    %245 = vector.multi_reduction <add>, %16, %cst_127 [0] : vector<32x128xf32> to vector<128xf32>
    %246 = vector.shape_cast %245 : vector<128xf32> to vector<1x128xf32>
    %cst_128 = arith.constant dense<0.000000e+00> : vector<1x8xf32>
    %247 = tpu.matmul %246, %243, %cst_128 {dimension_numbers = #tpu.dot_dimension_numbers<[1], [0], [0], [1], [0, 0, 1, 1], [], []>} : vector<1x128xf32>, vector<128x8xf32>, vector<1x8xf32> -> vector<1x8xf32>
    %248 = arith.mulf %16, %16 : vector<32x128xf32>
    %cst_129 = arith.constant dense<0.000000e+00> : vector<128xf32>
    %249 = vector.multi_reduction <add>, %248, %cst_129 [0] : vector<32x128xf32> to vector<128xf32>
    %250 = vector.shape_cast %249 : vector<128xf32> to vector<1x128xf32>
    %cst_130 = arith.constant dense<0.000000e+00> : vector<1x8xf32>
    %251 = tpu.matmul %250, %243, %cst_130 {dimension_numbers = #tpu.dot_dimension_numbers<[1], [0], [0], [1], [0, 0, 1, 1], [], []>} : vector<1x128xf32>, vector<128x8xf32>, vector<1x8xf32> -> vector<1x8xf32>
    %cst_131 = arith.constant 0.001953125 : f32
    %252 = vector.broadcast %cst_131 : f32 to vector<1x8xf32>
    %253 = arith.mulf %247, %252 : vector<1x8xf32>
    %cst_132 = arith.constant 0.001953125 : f32
    %254 = vector.broadcast %cst_132 : f32 to vector<1x8xf32>
    %255 = arith.mulf %251, %254 : vector<1x8xf32>
    %256 = arith.mulf %253, %253 : vector<1x8xf32>
    %257 = arith.subf %255, %256 : vector<1x8xf32>
    %cst_133 = arith.constant 9.99999974E-6 : f32
    %258 = vector.broadcast %cst_133 : f32 to vector<1x8xf32>
    %259 = arith.addf %257, %258 : vector<1x8xf32>
    %260 = math.rsqrt %259 : vector<1x8xf32>
    %261 = arith.mulf %6, %260 : vector<1x8xf32>
    %262 = arith.mulf %253, %261 : vector<1x8xf32>
    %263 = arith.subf %7, %262 : vector<1x8xf32>
    %cst_134 = arith.constant dense<0.000000e+00> : vector<1x128xf32>
    %264 = tpu.matmul %261, %244, %cst_134 {dimension_numbers = #tpu.dot_dimension_numbers<[1], [0], [0], [1], [0, 0, 1, 1], [], []>} : vector<1x8xf32>, vector<8x128xf32>, vector<1x128xf32> -> vector<1x128xf32>
    %cst_135 = arith.constant dense<0.000000e+00> : vector<1x128xf32>
    %265 = tpu.matmul %263, %244, %cst_135 {dimension_numbers = #tpu.dot_dimension_numbers<[1], [0], [0], [1], [0, 0, 1, 1], [], []>} : vector<1x8xf32>, vector<8x128xf32>, vector<1x128xf32> -> vector<1x128xf32>
    %266 = vector.broadcast %264 : vector<1x128xf32> to vector<32x128xf32>
    %267 = arith.mulf %16, %266 : vector<32x128xf32>
    %268 = vector.broadcast %265 : vector<1x128xf32> to vector<32x128xf32>
    %269 = arith.addf %267, %268 : vector<32x128xf32>
    %270 = arith.addf %242, %269 : vector<32x128xf32>
    %c0_136 = arith.constant 0 : index
    %c0_137 = arith.constant 0 : index
    %271 = vector.load %arg13[%c0_136, %c0_137] : memref<32x128xf32, #tpu.memory_space<vmem>>, vector<32x128xf32>
    tpu.vector_store %arg13[%c0_136, %c0_137], %270 {strides = array<i32>} : memref<32x128xf32, #tpu.memory_space<vmem>>, vector<32x128xf32>,
    return
  }
}

</mosaic_0001>

<bundles_post_ra>
// kernel: tpu_custom_call.1
= control target key start
LH: loop header
LB: loop body
LE: loop exit
PB: predicated region body
PF: predicated region fallthrough
CT: control target
= control target key end

     0   :  { %v3882_v2 = vmov 0   ;;  %vm152_vm0 = vcmask 523264   ;;  %s5331_s0 = inlined_call_operand.vmem [shape: bf16[32,64], index: 0, kind: input, shape index: {}]   ;;  %s5332_s1 = inlined_call_operand.vmem [shape: bf16[64,384], index: 1, kind: input, shape index: {}]   ;;  %s5333_s2 = inlined_call_operand.vmem [shape: bf16[256,128], index: 2, kind: input, shape index: {}]   ;;  %s5334_s3 = inlined_call_operand.vmem [shape: f32[9,256], index: 3, kind: input, shape index: {}]   ;;  %s5335_s4 = inlined_call_operand.vmem [shape: f32[32,3], index: 4, kind: input, shape index: {}]   ;;  %s5336_s5 = inlined_call_operand.vmem [shape: f32[256,16], index: 5, kind: input, shape index: {}]   ;;  %s5337_s6 = inlined_call_operand.vmem [shape: f32[16,256], index: 6, kind: input, shape index: {}]   ;;  %s5338_s7 = inlined_call_operand.vmem [shape: f32[128,8], index: 7, kind: input, shape index: {}]   ;;  %s5339_s8 = inlined_call_operand.vmem [shape: f32[8,128], index: 8, kind: input, shape index: {}]   ;;  %s5340_s9 = inlined_call_operand.vmem [shape: f32[2,32], index: 9, kind: input, shape index: {}]   ;;  %s5341_s10 = inlined_call_operand.vmem [shape: f32[12,16], index: 10, kind: input, shape index: {}]   ;;  %s5342_s11 = inlined_call_operand.vmem [shape: f32[16,4], index: 11, kind: input, shape index: {}]   ;;  %s5343_s12 = inlined_call_operand.vmem [shape: f32[4,16], index: 12, kind: input, shape index: {}]   ;;  %s5344_s13 = inlined_call_operand.hbm [shape: f32[32,128], index: 13, kind: output, shape index: {}]  }
   0x1   :  { %v3812_v0 = vld [vmem:[%s5332_s1 + $0x4] ss:$12 sps:$4 sm:$0xff]   ;;  %v3814_v1 = vld [vmem:[%s5332_s1] ss:$12 sps:$4 sm:$0xff]   ;;  %191 = vmatprep.mubr.bf16.mxu0 %v3882_v2  ;;  %3809 = vset.pattern.permute.xlu1 %v3882_v2  ;;  %v3815_v3 = vld [vmem:[%s5332_s1 + $0x1c] ss:$12 sps:$4 sm:$0xff]  }
   0x2   :  { %159 = vmatprep.subr.bf16.mxu0 %v3812_v0  ;;  %3808 = vset.pattern.permute.xlu0 %v3882_v2  ;;  %v3817_v4 = vld [vmem:[%s5332_s1 + $0x18] ss:$12 sps:$4 sm:$0xff]   ;;  %v3818_v5 = vld [vmem:[%s5332_s1 + $0x34] ss:$12 sps:$4 sm:$0xff]   ;;  %v3820_v6 = vld [vmem:[%s5332_s1 + $0x30] ss:$12 sps:$4 sm:$0xff]  }
   0x3   :  { %160 = vmatpush1.bf16.msra.mxu0 %v3814_v1  ;;  %v3824_v7 = vld [vmem:[%s5331_s0] sm:$0xff]   ;;  %v3821_v8 = vld [vmem:[%s5332_s1 + $0x4c] ss:$12 sps:$4 sm:$0xff]   ;;  %v3826_v9 = vld [vmem:[%s5332_s1 + $0x8] ss:$12 sps:$4 sm:$0xff]  }
   0x4   :  { %161 = vmatprep.subr.bf16.mxu0 %v3815_v3  ;;  %3335 = vmatprep.mubr.msk.bf16.mxu1 %vm152_vm0, %v3824_v7  ;;  %v3827_v10 = vld [vmem:[%s5332_s1 + $0x20] ss:$12 sps:$4 sm:$0xff]   ;;  %v3823_v11 = vld [vmem:[%s5332_s1 + $0x48] ss:$12 sps:$4 sm:$0xff]   ;;  %v3828_v12 = vld [vmem:[%s5332_s1 + $0x38] ss:$12 sps:$4 sm:$0xff]  }
   0x5   :  { %3327 = vmatprep.subr.bf16.mxu1 %v3826_v9  ;;  %v277_v13 = vld [vmem:[%s5336_s5 + $0x80] sm:$0xff]  ;;  %v278_v14 = vld [vmem:[%s5336_s5 + $0x88] sm:$0xff]  ;;  %v279_v18 = vld [vmem:[%s5336_s5 + $0x90] sm:$0xff] }
   0x6   :  { %3328 = vmatpush3.bf16.msra.mxu1 %v3826_v9  ;;  %v4005_v15 = vpack.c.bf16 %v278_v14, %v277_v13  ;;  %v261_v16 = vld [vmem:[%s5336_s5] sm:$0xff]  ;;  %v262_v17 = vld [vmem:[%s5336_s5 + $0x8] sm:$0xff]  ;;  %v280_v19 = vld [vmem:[%s5336_s5 + $0x98] sm:$0xff] }
   0x7   :  { %162 = vmatpush1.bf16.msra.mxu0 %v3817_v4  ;;  %3329 = vmatprep.subr.bf16.mxu1 %v3827_v10  ;;  %v3829_v20 = vld [vmem:[%s5332_s1 + $0x50] ss:$12 sps:$4 sm:$0xff]   ;;  %v4023_v21 = vpack.c.bf16 %v262_v17, %v261_v16  ;;  %v4025_v22 = vpack.c.bf16 %v280_v19, %v279_v18  ;;  %v3825_v23 = vld [vmem:[%s5331_s0 + $0x8] sm:$0xff]  }
   0x8   :  { %163 = vmatprep.subr.bf16.mxu0 %v3818_v5  ;;  %5381 = vst [vmem:[#allocation5_spill] sm:$0xff] %v4005_v15 }
   0x9   :  { %5382 = vst [vmem:[#allocation6_spill] sm:$0xff] %v4023_v21  ;;  %5383 = vst [vmem:[#allocation7_spill] sm:$0xff] %v4025_v22 }
   0xa   :  { %3330 = vmatpush3.bf16.msra.mxu1 %v3827_v10 }
   0xb   :  { %164 = vmatpush1.bf16.msra.mxu0 %v3820_v6  ;;  %3331 = vmatprep.subr.bf16.mxu1 %v3828_v12 }
   0xc   :  { %165 = vmatprep.subr.bf16.mxu0 %v3821_v8 }
   0xe   :  { %3332 = vmatpush3.bf16.msra.mxu1 %v3828_v12 }
   0xf   :  { %166 = vmatpush1.bf16.msra.mxu0 %v3823_v11  ;;  %3333 = vmatprep.subr.bf16.mxu1 %v3829_v20 }
  0x10   :  { %3512 = vmatprep.subr.bf16.mxu0 %v4005_v15 }
  0x12   :  { %2992 = vmatmul.mubr.msk.bf16.vlgmr.msra.gmra.mrb[0].mxu0 %vm152_vm0, %v3824_v7  ;;  %3334 = vmatpush3.bf16.msra.mxu1 %v3829_v20 }
  0x13   :  { %201 = vmatprep.mubr.bf16.mxu0 %v3882_v2  ;;  %3514 = vmatpush3.bf16.msra.mxu0 %v4023_v21 }
  0x14   :  { %3516 = vmatprep.subr.bf16.mxu0 %v4025_v22  ;;  %3544 = vmatprep.subr.bf16.mxu1 %v4005_v15 }
  0x15   :  { %18 = vsyncpa [#allocation3], 0  ;;  %3336 = vmatmul.mubr.msk.bf16.vlgmr.msra.gmra.mrb[0].mxu1 %vm152_vm0, %v3825_v23  ;;  %v263_v24 = vld [vmem:[%s5336_s5 + $0x10] sm:$0xff]  ;;  %v264_v25 = vld [vmem:[%s5336_s5 + $0x18] sm:$0xff]  ;;  %vm490_vm1 = vcmask 130048   ;;  %s3885_s24 = smov 16  }
  0x16   :  { %3546 = vmatpush3.bf16.msra.mxu1 %v4023_v21  ;;  %v4044_v26 = vpack.c.bf16 %v264_v25, %v263_v24  ;;  %v281_v27 = vld [vmem:[%s5336_s5 + $0xa0] sm:$0xff]  ;;  %v282_v28 = vld [vmem:[%s5336_s5 + $0xa8] sm:$0xff]  ;;  %v283_v33 = vld [vmem:[%s5336_s5 + $0xb0] sm:$0xff]  ;;  %s3886_s25 = smov 112   ;;  %vm1577_vm6 = vcmask 261120   ;;  %vm3888_vm7 = vmmov 0  }
  0x17   :  { %3548 = vmatprep.subr.bf16.mxu1 %v4025_v22  ;;  %v4054_v29 = vpack.c.bf16 %v282_v28, %v281_v27  ;;  %v265_v30 = vld [vmem:[%s5336_s5 + $0x20] sm:$0xff]  ;;  %v266_v31 = vld [vmem:[%s5336_s5 + $0x28] sm:$0xff]  ;;  %v284_v34 = vld [vmem:[%s5336_s5 + $0xb8] sm:$0xff]  ;;  %vm1839_vm8 = vcmask 1043456   ;;  %vm1798_vm9 = vcmask 25600   ;;  %vm1835_vm10 = vcmask 31744  }
  0x18   :  { %5384 = vst [vmem:[#allocation8_spill] sm:$0xff] %v4044_v26  ;;  %3518 = vmatpush3.bf16.msra.mxu0 %v4044_v26  ;;  %v4062_v32 = vpack.c.bf16 %v266_v31, %v265_v30  ;;  %v4074_v35 = vpack.c.bf16 %v284_v34, %v283_v33  ;;  %v267_v36 = vld [vmem:[%s5336_s5 + $0x30] sm:$0xff]  ;;  %v268_v37 = vld [vmem:[%s5336_s5 + $0x38] sm:$0xff]  ;;  %v285_v39 = vld [vmem:[%s5336_s5 + $0xc0] sm:$0xff]  ;;  %vm1913_vm11 = vcmask 123904   ;;  %vm2458_vm12 = vcmask 64512  }
  0x19   :  { %5385 = vst [vmem:[#allocation9_spill] sm:$0xff] %v4054_v29  ;;  %3520 = vmatprep.subr.bf16.mxu0 %v4054_v29  ;;  %v4082_v38 = vpack.c.bf16 %v268_v37, %v267_v36  ;;  %v286_v40 = vld [vmem:[%s5336_s5 + $0xc8] sm:$0xff]  ;;  %v269_v42 = vld [vmem:[%s5336_s5 + $0x40] sm:$0xff]  ;;  %v287_v45 = vld [vmem:[%s5336_s5 + $0xd0] sm:$0xff] }
  0x1a   :  { %2993 = vmatmul.mubr.msk.bf16.gmra.mrb[4].mxu0 %vm152_vm0, %v3825_v23  ;;  %3550 = vmatpush3.bf16.msra.mxu1 %v4044_v26  ;;  %5386 = vst [vmem:[#allocation10_spill] sm:$0xff] %v4062_v32  ;;  %5387 = vst [vmem:[#allocation11_spill] sm:$0xff] %v4074_v35  ;;  %v4094_v41 = vpack.c.bf16 %v286_v40, %v285_v39  ;;  %v270_v43 = vld [vmem:[%s5336_s5 + $0x48] sm:$0xff]  ;;  %v288_v46 = vld [vmem:[%s5336_s5 + $0xd8] sm:$0xff] }
  0x1b   :  { %3552 = vmatprep.subr.bf16.mxu1 %v4054_v29  ;;  %5388 = vst [vmem:[#allocation12_spill] sm:$0xff] %v4082_v38  ;;  %v4102_v44 = vpack.c.bf16 %v270_v43, %v269_v42  ;;  %v4114_v47 = vpack.c.bf16 %v288_v46, %v287_v45  ;;  %v271_v48 = vld [vmem:[%s5336_s5 + $0x50] sm:$0xff]  ;;  %v272_v49 = vld [vmem:[%s5336_s5 + $0x58] sm:$0xff]  ;;  %v289_v51 = vld [vmem:[%s5336_s5 + $0xe0] sm:$0xff] }
  0x1c   :  { %3522 = vmatpush3.bf16.msra.mxu0 %v4062_v32  ;;  %5389 = vst [vmem:[#allocation13_spill] sm:$0xff] %v4094_v41  ;;  %v4122_v50 = vpack.c.bf16 %v272_v49, %v271_v48  ;;  %v290_v52 = vld [vmem:[%s5336_s5 + $0xe8] sm:$0xff]  ;;  %v273_v54 = vld [vmem:[%s5336_s5 + $0x60] sm:$0xff]  ;;  %v291_v57 = vld [vmem:[%s5336_s5 + $0xf0] sm:$0xff] }
  0x1d   :  { %3524 = vmatprep.subr.bf16.mxu0 %v4074_v35  ;;  %5390 = vst [vmem:[#allocation14_spill] sm:$0xff] %v4102_v44  ;;  %5391 = vst [vmem:[#allocation15_spill] sm:$0xff] %v4114_v47  ;;  %v4134_v53 = vpack.c.bf16 %v290_v52, %v289_v51  ;;  %v274_v55 = vld [vmem:[%s5336_s5 + $0x68] sm:$0xff]  ;;  %v292_v58 = vld [vmem:[%s5336_s5 + $0xf8] sm:$0xff] }
  0x1e   :  { %3554 = vmatpush3.bf16.msra.mxu1 %v4062_v32  ;;  %5392 = vst [vmem:[#allocation16_spill] sm:$0xff] %v4122_v50  ;;  %v4142_v56 = vpack.c.bf16 %v274_v55, %v273_v54  ;;  %v4154_v59 = vpack.c.bf16 %v292_v58, %v291_v57  ;;  %v275_v60 = vld [vmem:[%s5336_s5 + $0x70] sm:$0xff]  ;;  %v276_v61 = vld [vmem:[%s5336_s5 + $0x78] sm:$0xff] }
  0x1f   :  { %3556 = vmatprep.subr.bf16.mxu1 %v4074_v35  ;;  %5393 = vst [vmem:[#allocation17_spill] sm:$0xff] %v4134_v53  ;;  %v4162_v62 = vpack.c.bf16 %v276_v61, %v275_v60 }
  0x20   :  { %3526 = vmatpush3.bf16.msra.mxu0 %v4082_v38  ;;  %5394 = vst [vmem:[#allocation18_spill] sm:$0xff] %v4142_v56  ;;  %5395 = vst [vmem:[#allocation19_spill] sm:$0xff] %v4154_v59 }
  0x21   :  { %3528 = vmatprep.subr.bf16.mxu0 %v4094_v41  ;;  %5396 = vst [vmem:[#allocation20_spill] sm:$0xff] %v4162_v62 }
  0x22   :  { %3558 = vmatpush3.bf16.msra.mxu1 %v4082_v38 }
  0x23   :  { %3560 = vmatprep.subr.bf16.mxu1 %v4094_v41 }
  0x24   :  { %3530 = vmatpush3.bf16.msra.mxu0 %v4102_v44 }
  0x25   :  { %3532 = vmatprep.subr.bf16.mxu0 %v4114_v47 }
  0x26   :  { %3562 = vmatpush3.bf16.msra.mxu1 %v4102_v44 }
  0x27   :  { %3564 = vmatprep.subr.bf16.mxu1 %v4114_v47 }
  0x28   :  { %3534 = vmatpush3.bf16.msra.mxu0 %v4122_v50 }
  0x29   :  { %3536 = vmatprep.subr.bf16.mxu0 %v4134_v53 }
  0x2a   :  { %3566 = vmatpush3.bf16.msra.mxu1 %v4122_v50 }
  0x2b   :  { %3568 = vmatprep.subr.bf16.mxu1 %v4134_v53 }
  0x2c   :  { %3538 = vmatpush3.bf16.msra.mxu0 %v4142_v56 }
  0x2d   :  { %3540 = vmatprep.subr.bf16.mxu0 %v4154_v59 }
  0x2e   :  { %3570 = vmatpush3.bf16.msra.mxu1 %v4142_v56 }
  0x2f   :  { %3572 = vmatprep.subr.bf16.mxu1 %v4154_v59 }
  0x30   :  { %3542 = vmatpush3.bf16.msra.mxu0 %v4162_v62 }
  0x32   :  { %3574 = vmatpush3.bf16.msra.mxu1 %v4162_v62 }
  0xe5   :  { %v4168_v63 = vpop.f32.mrb[0].mxu0 }
  0xe6   :  { %v4170_v0 = vpop.f32.mrb[1].mxu0  ;;  %v385_v2 = vmul.f32 %v4168_v63, %v4168_v63 }
  0xe7   :  { %v4172_v1 = vpop.f32.mrb[2].mxu0  ;;  %v386_v6 = vmul.f32 %v4170_v0, %v4170_v0 }
  0xe8   :  { %v297_v3 = vadd.f32 %v4172_v1, %v4168_v63  ;;  %v387_v4 = vmul.f32 %v4172_v1, %v4172_v1  ;;  %v4180_v5 = vpop.f32.mrb[3].mxu0  ;;  %v4190_v12 = vpop.f32.mrb[0].mxu1 }
  0xe9   :  { %v306_v7 = vadd.f32 %v4180_v5, %v4170_v0  ;;  %v388_v8 = vmul.f32 %v4180_v5, %v4180_v5  ;;  %5397 = vst [vmem:[#allocation21_spill] sm:$0xff] %v4190_v12  ;;  %v4197_v17 = vpop.f32.mrb[1].mxu1  ;;  %v2702_v42 = vmul.f32 %v4190_v12, %v4190_v12 }
  0xea   :  { %v393_v9 = vadd.f32 %v387_v4, %v385_v2  ;;  %5398 = vst [vmem:[#allocation22_spill] sm:$0xff] %v4197_v17  ;;  %v4204_v23 = vpop.f32.mrb[2].mxu1  ;;  %v2700_v30 = vmul.f32 %v4197_v17, %v4197_v17 }
  0xeb   :  { %v402_v10 = vadd.f32 %v388_v8, %v386_v6  ;;  %5399 = vst [vmem:[#allocation23_spill] sm:$0xff] %v4204_v23  ;;  %v4213_v31 = vpop.f32.mrb[3].mxu1  ;;  %v2703_v52 = vmul.f32 %v4204_v23, %v4204_v23 }
  0xec   :  { %5400 = vst [vmem:[#allocation24_spill] sm:$0xff] %v4213_v31  ;;  %v2621_v37 = vadd.f32 %v4213_v31, %v4197_v17  ;;  %v2701_v43 = vmul.f32 %v4213_v31, %v4213_v31 }
  0xed   :  { %v4188_v11 = vpop.f32.mrb[4].mxu0 }
  0xee   :  { %v298_v13 = vadd.f32 %v297_v3, %v4188_v11  ;;  %v389_v14 = vmul.f32 %v4188_v11, %v4188_v11  ;;  %v4195_v16 = vpop.f32.mrb[5].mxu0  ;;  %v2622_v48 = vadd.f32 %v4190_v12, %v2621_v37  ;;  %v2704_v54 = vadd.f32 %v2701_v43, %v2700_v30  ;;  %v296_v37 = vld [vmem:[%s5337_s6 + $0x18] sm:$0xff] }
  0xef   :  { %v307_v18 = vadd.f32 %v306_v7, %v4195_v16  ;;  %v390_v19 = vmul.f32 %v4195_v16, %v4195_v16  ;;  %v4202_v20 = vpop.f32.mrb[6].mxu0  ;;  %v5345_v43 = vmov 0.0  }
  0xf0   :  { %v394_v24 = vadd.f32 %v393_v9, %v389_v14  ;;  %v299_v25 = vadd.f32 %v298_v13, %v4202_v20  ;;  %v391_v27 = vmul.f32 %v4202_v20, %v4202_v20  ;;  %v4209_v28 = vpop.f32.mrb[7].mxu0  ;;  %v4228_v58 = vadd.f32 %v4204_v23, %v2622_v48  ;;  %v751_v48 = vld [vmem:[%s5335_s4] sm:$0xff] }
  0xf1   :  { %v403_v33 = vadd.f32 %v402_v10, %v390_v19  ;;  %v308_v34 = vadd.f32 %v307_v18, %v4209_v28  ;;  %v392_v36 = vmul.f32 %v4209_v28, %v4209_v28  ;;  %v2705_v2 = vadd.f32 %v2704_v54, %v2702_v42  ;;  %v295_v42 = vld [vmem:[%s5337_s6 + $0x10] sm:$0xff]  ;;  %757 = vperm.xlu0 %3808, %v751_v48  }
  0xf2   :  { %v300_v39 = vrot.slane %v299_v25, 4  ;;  %v395_v40 = vadd.f32 %v394_v24, %v391_v27  ;;  %5401 = vst [vmem:[#allocation25_spill] sm:$0xff] %v4228_v58 }
  0xf3   :  { %v309_v45 = vrot.slane %v308_v34, 4  ;;  %v404_v46 = vadd.f32 %v403_v33, %v392_v36  ;;  %v4230_v8 = vadd.f32 %v2705_v2, %v2703_v52  ;;  %v294_v36 = vld [vmem:[%s5337_s6 + $0x8] sm:$0xff]  ;;  %v3884_v52 = vmov 2  }
  0xf4   :  { %v301_v49 = vadd.f32 %v300_v39, %v299_v25  ;;  %v396_v51 = vrot.slane %v395_v40, 4  ;;  %v293_v39 = vld [vmem:[%s5337_s6] sm:$0xff] }
  0xf5   :  { %v310_v55 = vadd.f32 %v309_v45, %v308_v34  ;;  %v405_v57 = vrot.slane %v404_v46, 4  ;;  %5402 = vst [vmem:[#allocation26_spill] sm:$0xff] %v4230_v8  ;;  %v4248_v45 = vpack.c.bf16 %v295_v42, %v293_v39 }
  0xf6   :  { %v302_v60 = vrot.slane %v301_v49, 2  ;;  %v397_v61 = vadd.f32 %v396_v51, %v395_v40  ;;  %v4241_v40 = vpack.c.bf16 %v296_v37, %v294_v36  ;;  %v752_v51 = vld [vmem:[%s5335_s4 + $0x8] sm:$0xff] }
  0xf7   :  { %v311_v3 = vrot.slane %v310_v55, 2  ;;  %v406_v4 = vadd.f32 %v405_v57, %v404_v46  ;;  %5404 = vst [vmem:[#allocation28_spill] sm:$0xff] %v4248_v45  ;;  %v753_v46 = vld [vmem:[%s5335_s4 + $0x10] sm:$0xff]  ;;  %762 = vperm.xlu0 %3808, %v752_v51  }
  0xf8   :  { %v303_v6 = vadd.f32 %v302_v60, %v301_v49  ;;  %v398_v7 = vrot.slane %v397_v61, 2  ;;  %5403 = vst [vmem:[#allocation27_spill] sm:$0xff] %v4241_v40  ;;  %3576 = vmatprep.subr.bf16.mxu0 %v4241_v40  ;;  %3580 = vmatprep.subr.bf16.mxu1 %v4241_v40  ;;  %v754_v49 = vld [vmem:[%s5335_s4 + $0x18] sm:$0xff] }
  0xf9   :  { %v312_v9 = vadd.f32 %v311_v3, %v310_v55  ;;  %v407_v10 = vrot.slane %v406_v4, 2  ;;  %767 = vperm.xlu1 %3809, %v753_v46  }
  0xfa   :  { %v304_v13 = vrot.slane %v303_v6, 1  ;;  %v399_v14 = vadd.f32 %v398_v7, %v397_v61 }
  0xfb   :  { %v313_v18 = vrot.slane %v312_v9, 1  ;;  %v408_v19 = vadd.f32 %v407_v10, %v406_v4  ;;  %3810 = vset.pattern.permute.xlu0 %v3884_v52  ;;  %v46_v10 = vld [vmem:[%s5341_s10] sm:$0x1] }
  0xfc   :  { %v400_v24 = vrot.slane %v399_v14, 1  ;;  %v305_v30 = vadd.f32 %v304_v13, %v303_v6  ;;  %1045 = vperm.xlu0 %3810, %v751_v48  }
  0xfd   :  { %v314_v25 = vadd.f32 %v313_v18, %v312_v9  ;;  %v409_v27 = vrot.slane %v408_v19, 1  ;;  %772 = vperm.xlu1 %3809, %v754_v49   ;;  %v47_v18 = vld [vmem:[%s5341_s10 + $0x1] sm:$0x1] }
  0xfe   :  { %v401_v34 = vadd.f32 %v400_v24, %v399_v14 }
  0xff   :  { %379 = vmatprep.mubr.f32.mxu0 %v314_v25  ;;  %v410_v33 = vadd.f32 %v409_v27, %v408_v19  ;;  %v639_v25 = vlaneseq }
 0x100   :  { %380 = vmatmul.mubr.f32.vlgmr.msra.gmra.mrb[8].mxu0 %v305_v30  ;;  %1057 = vperm.xlu0 %3810, %v754_v49  }
 0x101   :  { %475 = vmatprep.mubr.f32.mxu1 %v410_v33  ;;  %558 = vmatprep.mubr.f32.mxu0 %v5345_v43  ;;  %v4309_v27 = vshrl.u32 %v639_v25, 7 }
 0x102   :  { %476 = vmatmul.mubr.f32.vlgmr.msra.gmra.mrb[4].mxu1 %v401_v34  ;;  %3578 = vmatpush1.bf16.msra.mxu0 %v4248_v45 }
 0x103   :  { %632 = vmatprep.mubr.f32.mxu1 %v5345_v43  ;;  %3582 = vmatpush1.bf16.msra.mxu1 %v4248_v45  ;;  %v4312_v30 = vsub.s32 0, %v4309_v27  ;;  %vm742_vm2 = vcmp.lt.s32.totalorder %v4309_v27, 1  ;;  %vm1035_vm3 = vcmp.lt.s32.totalorder %v4309_v27, 7 }
 0x104   :  { %3584 = vmatprep.subr.bf16.mxu0 %v4005_v15  ;;  %3616 = vmatprep.subr.bf16.mxu1 %v4005_v15 }
 0x105   :  { %3811 = vset.pattern.permute.xlu1 %v3884_v52 }
 0x106   :  { %1049 = vperm.xlu1 %3811, %v752_v51  }
 0x10a   :  { %1053 = vperm.xlu1 %3811, %v753_v46  }
 0x1d3   :  { %v3075_v54 = vpop.f32.mrb[8].mxu0 }
 0x1d4   :  { %v3076_v55 = vpop.f32.mrb[9].mxu0 }
 0x1d5   :  { %v3077_v57 = vadd.f32 %v3076_v55, %v3075_v54  ;;  %v3110_v60 = vpop.f32.mrb[4].mxu1 }
 0x1d6   :  { %v3111_v61 = vpop.f32.mrb[5].mxu1 }
 0x1d7   :  { %v481_v2 = vmul.f32 0.001953125, %v3077_v57  ;;  %v3112_v3 = vadd.f32 %v3111_v61, %v3110_v60 }
 0x1d9   :  { %v483_v4 = vmul.f32 %v481_v2, %v481_v2  ;;  %v482_v6 = vmul.f32 0.001953125, %v3112_v3 }
 0x1db   :  { %v484_v7 = vsub.f32 %v482_v6, %v483_v4 }
 0x1dd   :  { %v485_v9 = vadd.f32 1e-05, %v484_v7 }
 0x1df   :  { %3846 = vrsqrt.f32 %v485_v9 }
 0x1e9   :  { %v3847_v13 = vpop.eup %3846 }
 0x1ea   :  { %v487_v14 = vmul.f32 %v3847_v13, %v46_v10 }
 0x1ec   :  { %2996 = vmatmul.mubr.msk.f32.vlgmr.msra.gmra.mrb[10].mxu0 %vm490_vm1, %v487_v14  ;;  %v488_v19 = vmul.f32 %v487_v14, %v481_v2 }
 0x1ed   :  { %3586 = vmatpush3.bf16.msra.mxu0 %v4023_v21 }
 0x1ee   :  { %v489_v24 = vsub.f32 %v47_v18, %v488_v19  ;;  %3588 = vmatprep.subr.bf16.mxu0 %v4025_v22 }
 0x1f0   :  { %2997 = vmatmul.mubr.msk.f32.vlgmr.msra.gmra.mrb[6].mxu1 %vm490_vm1, %v489_v24 }
 0x1f1   :  { %3618 = vmatpush3.bf16.msra.mxu1 %v4023_v21  ;;  %3590 = vmatpush3.bf16.msra.mxu0 %v4044_v26 }
 0x1f2   :  { %3620 = vmatprep.subr.bf16.mxu1 %v4025_v22  ;;  %3592 = vmatprep.subr.bf16.mxu0 %v4054_v29 }
 0x1f5   :  { %3622 = vmatpush3.bf16.msra.mxu1 %v4044_v26  ;;  %3594 = vmatpush3.bf16.msra.mxu0 %v4062_v32 }
 0x1f6   :  { %3624 = vmatprep.subr.bf16.mxu1 %v4054_v29  ;;  %3596 = vmatprep.subr.bf16.mxu0 %v4074_v35 }
 0x1f9   :  { %3626 = vmatpush3.bf16.msra.mxu1 %v4062_v32  ;;  %3598 = vmatpush3.bf16.msra.mxu0 %v4082_v38 }
 0x1fa   :  { %3628 = vmatprep.subr.bf16.mxu1 %v4074_v35  ;;  %3600 = vmatprep.subr.bf16.mxu0 %v4094_v41 }
 0x1fd   :  { %3630 = vmatpush3.bf16.msra.mxu1 %v4082_v38  ;;  %3602 = vmatpush3.bf16.msra.mxu0 %v4102_v44  ;;  %v3001_v38 = vld [vmem:[%s5334_s3 + $0x3] ss:$8 sm:$0x3] }
 0x1fe   :  { %3632 = vmatprep.subr.bf16.mxu1 %v4094_v41  ;;  %3604 = vmatprep.subr.bf16.mxu0 %v4114_v47  ;;  %v3004_v41 = vld [vmem:[%s5334_s3 + $0x7] ss:$8 sm:$0x3] }
 0x1ff   :  { %v4622_v15 = vrot.slane %v3004_v41, %v4312_v30 }
 0x201   :  { %3634 = vmatpush3.bf16.msra.mxu1 %v4102_v44  ;;  %3606 = vmatpush3.bf16.msra.mxu0 %v4122_v50 }
 0x202   :  { %3636 = vmatprep.subr.bf16.mxu1 %v4114_v47  ;;  %3608 = vmatprep.subr.bf16.mxu0 %v4134_v53  ;;  %v2999_v47 = vld [vmem:[%s5334_s3 + $0x1] ss:$8 sm:$0x3] }
 0x203   :  { %v844_v22 = vrot.slane %v2999_v47, %v4312_v30 }
 0x205   :  { %3638 = vmatpush3.bf16.msra.mxu1 %v4122_v50  ;;  %3610 = vmatpush3.bf16.msra.mxu0 %v4142_v56  ;;  %v810_v50 = vld [vmem:[%s5334_s3] ss:$8 sm:$0x3] }
 0x206   :  { %3640 = vmatprep.subr.bf16.mxu1 %v4134_v53  ;;  %3612 = vmatprep.subr.bf16.mxu0 %v4154_v59  ;;  %v4614_v29 = vrot.slane %v810_v50, %v4312_v30 }
 0x209   :  { %3642 = vmatpush3.bf16.msra.mxu1 %v4142_v56  ;;  %3614 = vmatpush3.bf16.msra.mxu0 %v4162_v62 }
 0x20a   :  { %3644 = vmatprep.subr.bf16.mxu1 %v4154_v59  ;;  %3648 = vmatprep.subr.bf16.mxu0 %v4241_v40 }
 0x20d   :  { %3646 = vmatpush3.bf16.msra.mxu1 %v4162_v62 }
 0x20e   :  { %3652 = vmatprep.subr.bf16.mxu1 %v4241_v40 }
 0x2bf   :  { %v560_v33 = vpop.f32.mrb[10].mxu0 }
 0x2c0   :  { %v642_v34 = vrot.slane %v560_v33, %v4312_v30  ;;  %v562_v36 = vpop.f32.mrb[11].mxu0 }
 0x2c1   :  { %v646_v37 = vrot.slane %v562_v36, %v4312_v30 }
 0x2c2   :  { %v647_v39 = vmul.f32 %v642_v34, %v4168_v63  ;;  %v649_v42 = vmul.f32 %v642_v34, %v4172_v1  ;;  %v651_v46 = vmul.f32 %v642_v34, %v4188_v11  ;;  %v653_v48 = vmul.f32 %v642_v34, %v4202_v20 }
 0x2c3   :  { %v648_v49 = vmul.f32 %v646_v37, %v4170_v0  ;;  %v650_v51 = vmul.f32 %v646_v37, %v4180_v5  ;;  %v652_v52 = vmul.f32 %v646_v37, %v4195_v16  ;;  %v654_v54 = vmul.f32 %v646_v37, %v4209_v28  ;;  %v634_v55 = vpop.f32.mrb[6].mxu1 }
 0x2c4   :  { %v658_v57 = vrot.slane %v634_v55, %v4312_v30  ;;  %v636_v60 = vpop.f32.mrb[7].mxu1 }
 0x2c5   :  { %v662_v63 = vrot.slane %v636_v60, %v4312_v30 }
 0x2c6   :  { %v663_v61 = vadd.f32 %v658_v57, %v647_v39  ;;  %v665_v1 = vadd.f32 %v658_v57, %v649_v42  ;;  %v667_v2 = vadd.f32 %v658_v57, %v651_v46  ;;  %v669_v11 = vadd.f32 %v658_v57, %v653_v48 }
 0x2c7   :  { %v664_v3 = vadd.f32 %v662_v63, %v648_v49  ;;  %v666_v20 = vadd.f32 %v662_v63, %v650_v51  ;;  %v668_v4 = vadd.f32 %v662_v63, %v652_v52  ;;  %v670_v0 = vadd.f32 %v662_v63, %v654_v54 }
 0x2c8   :  { %v671_v6 = vadd.f32 3.0, %v663_v61  ;;  %v673_v5 = vadd.f32 3.0, %v665_v1  ;;  %v675_v7 = vadd.f32 3.0, %v667_v2  ;;  %v677_v16 = vadd.f32 3.0, %v669_v11 }
 0x2c9   :  { %v672_v9 = vadd.f32 3.0, %v664_v3  ;;  %v674_v28 = vadd.f32 3.0, %v666_v20  ;;  %v676_v10 = vadd.f32 3.0, %v668_v4  ;;  %v678_v13 = vadd.f32 3.0, %v670_v0 }
 0x2ca   :  { %v679_v14 = vmax.f32 %v671_v6, 0.0  ;;  %v681_v18 = vmax.f32 %v673_v5, 0.0  ;;  %v683_v19 = vmax.f32 %v675_v7, 0.0  ;;  %v685_v24 = vmax.f32 %v677_v16, 0.0 }
 0x2cb   :  { %v680_v33 = vmax.f32 %v672_v9, 0.0  ;;  %v682_v34 = vmax.f32 %v674_v28, 0.0  ;;  %v684_v36 = vmax.f32 %v676_v10, 0.0  ;;  %v686_v37 = vmax.f32 %v678_v13, 0.0 }
 0x2cc   :  { %v687_v39 = vmin.f32 %v679_v14, 6.0  ;;  %v689_v42 = vmin.f32 %v681_v18, 6.0  ;;  %v691_v46 = vmin.f32 %v683_v19, 6.0  ;;  %v693_v48 = vmin.f32 %v685_v24, 6.0 }
 0x2cd   :  { %v688_v49 = vmin.f32 %v680_v33, 6.0  ;;  %v690_v51 = vmin.f32 %v682_v34, 6.0  ;;  %v692_v52 = vmin.f32 %v684_v36, 6.0  ;;  %v694_v54 = vmin.f32 %v686_v37, 6.0 }
 0x2ce   :  { %v695_v55 = vmul.f32 %v687_v39, %v663_v61  ;;  %v697_v57 = vmul.f32 %v689_v42, %v665_v1  ;;  %v699_v60 = vmul.f32 %v691_v46, %v667_v2  ;;  %v701_v63 = vmul.f32 %v693_v48, %v669_v11 }
 0x2cf   :  { %v696_v6 = vmul.f32 %v688_v49, %v664_v3  ;;  %v698_v5 = vmul.f32 %v690_v51, %v666_v20  ;;  %v700_v7 = vmul.f32 %v692_v52, %v668_v4  ;;  %v702_v16 = vmul.f32 %v694_v54, %v670_v0 }
 0x2d0   :  { %v4327_v9 = vmul.f32 0.16666667, %v695_v55  ;;  %v4329_v28 = vmul.f32 0.16666667, %v697_v57  ;;  %v4331_v10 = vmul.f32 0.16666667, %v699_v60 }
 0x2d1   :  { %v4333_v13 = vmul.f32 0.16666667, %v701_v63  ;;  %v4335_v14 = vmul.f32 0.16666667, %v696_v6  ;;  %v4337_v18 = vmul.f32 0.16666667, %v698_v5 }
 0x2d2   :  { %v4339_v61 = vmul.f32 0.16666667, %v700_v7  ;;  %v4341_v1 = vmul.f32 0.16666667, %v702_v16  ;;  %v734_v2 = vrot.slane %v4329_v28, 7  ;;  %v736_v11 = vrot.slane %v4331_v10, 7  ;;  %923 = vrot.lane.b32.xlu0 %v4329_v28, %s3885_s24  ;;  %921 = vrot.lane.b32.xlu1 %v4327_v9, %s3885_s24 }
 0x2d3   :  { %v735_v3 = vrot.slane %v4337_v18, 7  ;;  %v732_v20 = vrot.slane %v4327_v9, 7  ;;  %v733_v4 = vrot.slane %v4335_v14, 7  ;;  %v738_v0 = vrot.slane %v4333_v13, 7 }
 0x2d4   :  { %v737_v19 = vrot.slane %v4339_v61, 7  ;;  %v745_v24 = vsel %vm742_vm2, %v734_v2, %v736_v11  ;;  %v739_v33 = vrot.slane %v4341_v1, 7  ;;  %v1029_v49 = vrot.slane %v4329_v28, 1 }
 0x2d5   :  { %v749_v34 = vsel %vm742_vm2, %v738_v0, %v732_v20  ;;  %v743_v36 = vsel %vm742_vm2, %v736_v11, %v738_v0  ;;  %v747_v37 = vsel %vm742_vm2, %v732_v20, %v734_v2  ;;  %v748_v48 = vsel %vm742_vm2, %v733_v4, %v735_v3  ;;  %v768_v0 = vpop.permute.xlu1 %767 }
 0x2d6   :  { %v746_v39 = vsel %vm742_vm2, %v735_v3, %v737_v19  ;;  %v4367_v42 = vsel %vm742_vm2, %v739_v33, %v733_v4  ;;  %v744_v46 = vsel %vm742_vm2, %v737_v19, %v739_v33  ;;  %976 = vrot.lane.b32.xlu0 %v4329_v28, %s3886_s25  ;;  %925 = vrot.lane.b32.xlu1 %v4331_v10, %s3885_s24  ;;  %v1030_v51 = vrot.slane %v4337_v18, 1  ;;  %v758_v4 = vpop.permute.xlu0 %757 }
 0x2d7   :  { %v1031_v52 = vrot.slane %v4331_v10, 1  ;;  %v1032_v54 = vrot.slane %v4339_v61, 1  ;;  %v1027_v55 = vrot.slane %v4327_v9, 1  ;;  %v1028_v57 = vrot.slane %v4335_v14, 1 }
 0x2d8   :  { %v1033_v63 = vrot.slane %v4333_v13, 1  ;;  %v1034_v6 = vrot.slane %v4341_v1, 1 }
 0x2d9   :  { %v1038_v60 = vsel %vm1035_vm3, %v1029_v49, %v1031_v52  ;;  %v1039_v5 = vsel %vm1035_vm3, %v1030_v51, %v1032_v54  ;;  %v1040_v7 = vsel %vm1035_vm3, %v1027_v55, %v1029_v49  ;;  %v4398_v16 = vsel %vm1035_vm3, %v1028_v57, %v1030_v51  ;;  %v773_v51 = vpop.permute.xlu1 %772 }
 0x2da   :  { %931 = vrot.lane.b32.xlu0 %v4337_v18, %s3885_s24  ;;  %974 = vrot.lane.b32.xlu1 %v4327_v9, %s3886_s25  ;;  %v1036_v2 = vsel %vm1035_vm3, %v1031_v52, %v1033_v63  ;;  %v1037_v11 = vsel %vm1035_vm3, %v1032_v54, %v1034_v6  ;;  %v1042_v3 = vsel %vm1035_vm3, %v1033_v63, %v1027_v55  ;;  %v763_v19 = vpop.permute.xlu0 %762 }
 0x2db   :  { %v1043_v20 = vsel %vm1035_vm3, %v1034_v6, %v1028_v57  ;;  %v4428_v33 = vmul.f32 %v763_v19, %v747_v37  ;;  %v4430_v49 = vmul.f32 %v758_v4, %v749_v34  ;;  %v4436_v52 = vmul.f32 %v768_v0, %v745_v24 }
 0x2dc   :  { %v4444_v34 = vmul.f32 %v773_v51, %v743_v36  ;;  %v4454_v24 = vmul.f32 %v763_v19, %v748_v48  ;;  %v4460_v36 = vmul.f32 %v768_v0, %v746_v39  ;;  %v4466_v55 = vmul.f32 %v773_v51, %v744_v46 }
 0x2dd   :  { %v1050_v54 = vpop.permute.xlu1 %1049 }
 0x2de   :  { %933 = vrot.lane.b32.xlu0 %v4339_v61, %s3885_s24  ;;  %927 = vrot.lane.b32.xlu1 %v4333_v13, %s3885_s24  ;;  %v4442_v37 = vmul.f32 %v1050_v54, %v1038_v60  ;;  %v1046_v57 = vpop.permute.xlu0 %1045  ;;  %v4490_v6 = vmul.f32 %v1050_v54, %v1039_v5 }
 0x2df   :  { %v4468_v60 = vmul.f32 %v1046_v57, %v1040_v7  ;;  %v4493_v7 = vmul.f32 %v758_v4, %v4367_v42  ;;  %v4512_v42 = vmul.f32 %v1046_v57, %v4398_v16 }
 0x2e1   :  { %v1054_v48 = vpop.permute.xlu1 %1053 }
 0x2e2   :  { %984 = vrot.lane.b32.xlu0 %v4337_v18, %s3886_s25  ;;  %978 = vrot.lane.b32.xlu1 %v4331_v10, %s3886_s25  ;;  %v4474_v39 = vmul.f32 %v1054_v48, %v1036_v2  ;;  %v1058_v63 = vpop.permute.xlu0 %1057  ;;  %v4499_v2 = vmul.f32 %v1054_v48, %v1037_v11  ;;  %v4529_v11 = vand.u32 127, %v639_v25 }
 0x2e3   :  { %v4480_v46 = vmul.f32 %v1058_v63, %v1042_v3  ;;  %v4505_v3 = vmul.f32 %v1058_v63, %v1043_v20 }
 0x2e4   :  { %5406 = vst [vmem:[#allocation30_spill] sm:$0xff] %v4499_v2  ;;  %vm801_vm4 = vcmp.lt.s32.totalorder %v4529_v11, 16  ;;  %vm883_vm5 = vcmp.lt.s32.totalorder %v4529_v11, 112 }
 0x2e5   :  { %5405 = vst [vmem:[#allocation29_spill] sm:$0xff] %v4480_v46  ;;  %5407 = vst [vmem:[#allocation31_spill] sm:$0xff] %v4505_v3 }
 0x2e6   :  { %935 = vrot.lane.b32.xlu0 %v4341_v1, %s3885_s24  ;;  %980 = vrot.lane.b32.xlu1 %v4333_v13, %s3886_s25 }
 0x2ea   :  { %986 = vrot.lane.b32.xlu0 %v4339_v61, %s3886_s25  ;;  %929 = vrot.lane.b32.xlu1 %v4335_v14, %s3885_s24 }
 0x2ee   :  { %988 = vrot.lane.b32.xlu0 %v4341_v1, %s3886_s25  ;;  %982 = vrot.lane.b32.xlu1 %v4335_v14, %s3886_s25 }
 0x2f2   :  { %785 = vrot.lane.b32.xlu0 %v4428_v33, %s3885_s24  ;;  %783 = vrot.lane.b32.xlu1 %v4430_v49, %s3885_s24 }
 0x2f6   :  { %869 = vrot.lane.b32.xlu0 %v4428_v33, %s3886_s25  ;;  %787 = vrot.lane.b32.xlu1 %v4436_v52, %s3885_s24 }
 0x2fa   :  { %1070 = vrot.lane.b32.xlu0 %v4442_v37, %s3885_s24  ;;  %789 = vrot.lane.b32.xlu1 %v4444_v34, %s3885_s24 }
 0x2fe   :  { %1152 = vrot.lane.b32.xlu0 %v4442_v37, %s3886_s25  ;;  %867 = vrot.lane.b32.xlu1 %v4430_v49, %s3886_s25 }
 0x302   :  { %793 = vrot.lane.b32.xlu0 %v4454_v24, %s3885_s24  ;;  %871 = vrot.lane.b32.xlu1 %v4436_v52, %s3886_s25 }
 0x306   :  { %795 = vrot.lane.b32.xlu0 %v4460_v36, %s3885_s24  ;;  %873 = vrot.lane.b32.xlu1 %v4444_v34, %s3886_s25 }
 0x30a   :  { %797 = vrot.lane.b32.xlu0 %v4466_v55, %s3885_s24  ;;  %1068 = vrot.lane.b32.xlu1 %v4468_v60, %s3885_s24 }
 0x30e   :  { %877 = vrot.lane.b32.xlu0 %v4454_v24, %s3886_s25  ;;  %1072 = vrot.lane.b32.xlu1 %v4474_v39, %s3885_s24 }
 0x312   :  { %879 = vrot.lane.b32.xlu0 %v4460_v36, %s3886_s25  ;;  %1074 = vrot.lane.b32.xlu1 %v4480_v46, %s3885_s24 }
 0x316   :  { %881 = vrot.lane.b32.xlu0 %v4466_v55, %s3886_s25  ;;  %1150 = vrot.lane.b32.xlu1 %v4468_v60, %s3886_s25 }
 0x31a   :  { %1078 = vrot.lane.b32.xlu0 %v4490_v6, %s3885_s24  ;;  %791 = vrot.lane.b32.xlu1 %v4493_v7, %s3885_s24 }
 0x31e   :  { %1080 = vrot.lane.b32.xlu0 %v4499_v2, %s3885_s24  ;;  %875 = vrot.lane.b32.xlu1 %v4493_v7, %s3886_s25 }
 0x322   :  { %1082 = vrot.lane.b32.xlu0 %v4505_v3, %s3885_s24  ;;  %1154 = vrot.lane.b32.xlu1 %v4474_v39, %s3886_s25 }
 0x326   :  { %1160 = vrot.lane.b32.xlu0 %v4490_v6, %s3886_s25  ;;  %1076 = vrot.lane.b32.xlu1 %v4512_v42, %s3885_s24 }
 0x32a   :  { %1162 = vrot.lane.b32.xlu0 %v4499_v2, %s3886_s25  ;;  %1158 = vrot.lane.b32.xlu1 %v4512_v42, %s3886_s25 }
 0x32e   :  { %1164 = vrot.lane.b32.xlu0 %v4505_v3, %s3886_s25  ;;  %1156 = vrot.lane.b32.xlu1 %v4480_v46, %s3886_s25 }
 0x344   :  { %v924_v5 = vpop.permute.xlu0 %923  ;;  %v4526_v16 = vpop.permute.xlu1 %921 }
 0x348   :  { %v977_v20 = vpop.permute.xlu0 %976  ;;  %v926_v4 = vpop.permute.xlu1 %925 }
 0x34c   :  { %v932_v0 = vpop.permute.xlu0 %931  ;;  %v4532_v19 = vpop.permute.xlu1 %974 }
 0x34d   :  { %5408 = vst [vmem:[#allocation32_spill] sm:$0xff] %v4532_v19  ;;  %v4536_v51 = vsel %vm801_vm4, %v924_v5, %v932_v0  ;;  %v4540_v54 = vsel %vm801_vm4, %v932_v0, %v924_v5 }
 0x350   :  { %v934_v57 = vpop.permute.xlu0 %933  ;;  %v928_v48 = vpop.permute.xlu1 %927 }
 0x351   :  { %v4544_v25 = vsel %vm801_vm4, %v926_v4, %v934_v57  ;;  %v4548_v63 = vsel %vm801_vm4, %v934_v57, %v926_v4 }
 0x354   :  { %v985_v43 = vpop.permute.xlu0 %984  ;;  %v4551_v23 = vpop.permute.xlu1 %978 }
 0x355   :  { %v4555_v12 = vsel %vm883_vm5, %v977_v20, %v985_v43  ;;  %v4559_v5 = vsel %vm883_vm5, %v985_v43, %v977_v20 }
 0x358   :  { %v936_v0 = vpop.permute.xlu0 %935  ;;  %v4561_v31 = vpop.permute.xlu1 %980 }
 0x359   :  { %v4565_v4 = vsel %vm801_vm4, %v928_v48, %v936_v0  ;;  %v4569_v57 = vsel %vm801_vm4, %v936_v0, %v928_v48  ;;  %v4586_v48 = vsub.s32 1, %v4309_v27  ;;  %v2998_v0 = vld [vmem:[%s5334_s3 + $0x4] ss:$8 sm:$0x3] }
 0x35a   :  { %5409 = vst [vmem:[#allocation33_spill] sm:$0xff] %v4565_v4  ;;  %v4608_v35 = vrot.slane %v2998_v0, %v4312_v30 }
 0x35b   :  { %v4611_v32 = vrot.slane %v2998_v0, %v4586_v48  ;;  %v4617_v26 = vrot.slane %v810_v50, %v4586_v48  ;;  %v848_v21 = vrot.slane %v2999_v47, %v4586_v48  ;;  %v4625_v45 = vrot.slane %v3004_v41, %v4586_v48 }
 0x35c   :  { %v4571_v17 = vpop.permute.xlu0 %986  ;;  %v4573_v58 = vpop.permute.xlu1 %929  ;;  %v4628_v0 = vrot.slane %v3001_v38, %v4312_v30  ;;  %v4631_v46 = vrot.slane %v3001_v38, %v4586_v48  ;;  %v726_v2 = vmul.f32 %v4608_v35, %v4329_v28  ;;  %v855_v38 = vmul.f32 %v844_v22, %v4436_v52 }
 0x35d   :  { %v727_v41 = vmul.f32 %v4611_v32, %v4337_v18  ;;  %v854_v28 = vmul.f32 %v848_v21, %v4454_v24  ;;  %v728_v52 = vmul.f32 %v4608_v35, %v4331_v10  ;;  %v857_v10 = vmul.f32 %v844_v22, %v4444_v34 }
 0x360   :  { %v4575_v8 = vpop.permute.xlu0 %988  ;;  %v4577_v40 = vpop.permute.xlu1 %982 }
 0x361   :  { %5410 = vst [vmem:[#allocation34_spill] sm:$0xff] %v4577_v40  ;;  %v856_v40 = vmul.f32 %v848_v21, %v4460_v36  ;;  %v729_v36 = vmul.f32 %v4611_v32, %v4339_v61  ;;  %v858_v61 = vmul.f32 %v848_v21, %v4466_v55 }
 0x364   :  { %v786_v43 = vpop.permute.xlu0 %785  ;;  %v4579_v20 = vpop.permute.xlu1 %783 }
 0x365   :  { %5411 = vst [vmem:[#allocation35_spill] sm:$0xff] %v4579_v20  ;;  %v4648_v20 = vmul.f32 %v844_v22, %v4430_v49 }
 0x368   :  { %v4581_v62 = vpop.permute.xlu0 %869  ;;  %v788_v59 = vpop.permute.xlu1 %787 }
 0x36c   :  { %v4583_v56 = vpop.permute.xlu0 %1070  ;;  %v790_v53 = vpop.permute.xlu1 %789 }
 0x36d   :  { %5412 = vst [vmem:[#allocation36_spill] sm:$0xff] %v4583_v56  ;;  %v4651_v56 = vmul.f32 %v848_v21, %v4493_v7  ;;  %v731_v21 = vmul.f32 %v4611_v32, %v4341_v1 }
 0x370   :  { %v4597_v44 = vpop.permute.xlu0 %1152  ;;  %v4602_v27 = vpop.permute.xlu1 %867 }
 0x371   :  { %5413 = vst [vmem:[#allocation37_spill] sm:$0xff] %v4597_v44  ;;  %5414 = vst [vmem:[#allocation38_spill] sm:$0xff] %v4602_v27 }
 0x374   :  { %v794_v3 = vpop.permute.xlu0 %793  ;;  %v4633_v44 = vpop.permute.xlu1 %871 }
 0x375   :  { %v803_v50 = vsel %vm801_vm4, %v786_v43, %v794_v3  ;;  %v807_v47 = vsel %vm801_vm4, %v794_v3, %v786_v43  ;;  %v853_v3 = vmul.f32 %v844_v22, %v4428_v33 }
 0x376   :  { %v824_v27 = vmul.f32 %v4614_v29, %v807_v47  ;;  %v825_v19 = vmul.f32 %v4617_v26, %v803_v50  ;;  %v4674_v50 = vmul.f32 %v4622_v15, %v4442_v37 }
 0x378   :  { %v832_v43 = vadd.f32 %v824_v27, %v726_v2  ;;  %v833_v18 = vadd.f32 %v825_v19, %v727_v41  ;;  %v796_v4 = vpop.permute.xlu0 %795  ;;  %v4655_v47 = vpop.permute.xlu1 %873  ;;  %v3000_v19 = vld [vmem:[%s5334_s3 + $0x2] ss:$8 sm:$0x3] }
 0x379   :  { %v804_v49 = vsel %vm801_vm4, %v788_v59, %v796_v4  ;;  %v808_v7 = vsel %vm801_vm4, %v796_v4, %v788_v59  ;;  %v4678_v59 = vmul.f32 %v4625_v45, %v4490_v6  ;;  %v3002_v4 = vld [vmem:[%s5334_s3 + $0x5] ss:$8 sm:$0x3]  ;;  %v4694_v6 = vrot.slane %v3000_v19, %v4312_v30 }
 0x37a   :  { %v826_v33 = vmul.f32 %v4614_v29, %v808_v7  ;;  %v827_v24 = vmul.f32 %v4617_v26, %v804_v49  ;;  %v861_v2 = vadd.f32 %v853_v3, %v832_v43  ;;  %v862_v27 = vadd.f32 %v854_v28, %v833_v18 }
 0x37b   :  { %v730_v28 = vmul.f32 %v4608_v35, %v4333_v13  ;;  %v4697_v43 = vrot.slane %v3000_v19, %v4586_v48  ;;  %v4706_v49 = vmul.f32 %v4622_v15, %v4468_v60  ;;  %v4714_v7 = vmul.f32 %v4622_v15, %v4474_v39 }
 0x37c   :  { %v834_v41 = vadd.f32 %v826_v33, %v728_v52  ;;  %v835_v3 = vadd.f32 %v827_v24, %v729_v36  ;;  %v798_v22 = vpop.permute.xlu0 %797  ;;  %v4687_v34 = vpop.permute.xlu1 %1068  ;;  %v3003_v36 = vld [vmem:[%s5334_s3 + $0x6] ss:$8 sm:$0x3]  ;;  %v4717_v33 = vrot.slane %v3002_v4, %v4312_v30  ;;  %v4724_v60 = vmul.f32 %v4608_v35, %v4327_v9 }
 0x37d   :  { %v805_v37 = vsel %vm801_vm4, %v790_v53, %v798_v22  ;;  %v809_v55 = vsel %vm801_vm4, %v798_v22, %v790_v53  ;;  %v4710_v53 = vmul.f32 %v4625_v45, %v4512_v42  ;;  %v960_v22 = vmul.f32 %v4628_v0, %v4540_v54 }
 0x37e   :  { %v828_v13 = vmul.f32 %v4614_v29, %v809_v55  ;;  %v829_v18 = vmul.f32 %v4617_v26, %v805_v37  ;;  %v863_v1 = vadd.f32 %v855_v38, %v834_v41  ;;  %v864_v52 = vadd.f32 %v856_v40, %v835_v3 }
 0x37f   :  { %v4720_v40 = vrot.slane %v3002_v4, %v4586_v48  ;;  %v4736_v4 = vmul.f32 %v4611_v32, %v4335_v14  ;;  %v4739_v3 = vrot.slane %v3003_v36, %v4312_v30  ;;  %v961_v37 = vmul.f32 %v4631_v46, %v4536_v51 }
 0x380   :  { %v836_v38 = vadd.f32 %v828_v13, %v730_v28  ;;  %v837_v24 = vadd.f32 %v829_v18, %v731_v21  ;;  %v878_v19 = vpop.permute.xlu0 %877  ;;  %v4726_v41 = vpop.permute.xlu1 %1072  ;;  %v4750_v32 = vrot.slane %v3003_v36, %v4586_v48  ;;  %v992_v14 = vsel %vm883_vm5, %v4551_v23, %v4571_v17 }
 0x381   :  { %v885_v39 = vsel %vm883_vm5, %v4581_v62, %v878_v19  ;;  %v889_v42 = vsel %vm883_vm5, %v878_v19, %v4581_v62  ;;  %v962_v62 = vmul.f32 %v4628_v0, %v4548_v63  ;;  %v1013_v51 = vmul.f32 %v4717_v33, %v4555_v12 }
 0x382   :  { %v907_v35 = vmul.f32 %v4694_v6, %v885_v39  ;;  %v908_v9 = vmul.f32 %v4697_v43, %v889_v42  ;;  %v865_v28 = vadd.f32 %v857_v10, %v836_v38  ;;  %v866_v21 = vadd.f32 %v858_v61, %v837_v24 }
 0x383   :  { %v996_v10 = vsel %vm883_vm5, %v4571_v17, %v4551_v23  ;;  %v1014_v63 = vmul.f32 %v4720_v40, %v4559_v5  ;;  %v963_v12 = vmul.f32 %v4631_v46, %v4544_v25  ;;  %v1015_v5 = vmul.f32 %v4717_v33, %v992_v14 }
 0x384   :  { %v915_v54 = vadd.f32 %v907_v35, %v861_v2  ;;  %v916_v61 = vadd.f32 %v908_v9, %v862_v27  ;;  %v880_v55 = vpop.permute.xlu0 %879  ;;  %v4764_v13 = vpop.permute.xlu1 %1074  ;;  %v1016_v38 = vmul.f32 %v4720_v40, %v996_v10  ;;  %v941_v24 = vsel %vm801_vm4, %v4573_v58, %v4526_v16 }
 0x385   :  { %v886_v18 = vsel %vm883_vm5, %v4633_v44, %v880_v55  ;;  %v890_v36 = vsel %vm883_vm5, %v880_v55, %v4633_v44  ;;  %v993_v9 = vsel %vm883_vm5, %v4561_v31, %v4575_v8  ;;  %v997_v25 = vsel %vm883_vm5, %v4575_v8, %v4561_v31  ;;  %v5415_v31 = vld [vmem:[#allocation33_spill] sm:$0xff] }
 0x386   :  { %v968_v17 = vadd.f32 %v960_v22, %v915_v54  ;;  %v969_v23 = vadd.f32 %v961_v37, %v916_v61  ;;  %v909_v2 = vmul.f32 %v4694_v6, %v886_v18  ;;  %v910_v27 = vmul.f32 %v4697_v43, %v890_v36 }
 0x387   :  { %v964_v61 = vmul.f32 %v4628_v0, %v4569_v57  ;;  %v965_v8 = vmul.f32 %v4631_v46, %v5415_v31  ;;  %v937_v55 = vsel %vm801_vm4, %v4526_v16, %v4573_v58 }
 0x388   :  { %v917_v19 = vadd.f32 %v909_v2, %v863_v1  ;;  %v918_v44 = vadd.f32 %v910_v27, %v864_v52  ;;  %v882_v39 = vpop.permute.xlu0 %881  ;;  %v1021_v42 = vadd.f32 %v1013_v51, %v968_v17  ;;  %v1022_v35 = vadd.f32 %v1014_v63, %v969_v23  ;;  %v4790_v22 = vpop.permute.xlu1 %1150  ;;  %v5416_v2 = vld [vmem:[#allocation36_spill] sm:$0xff] }
 0x389   :  { %v887_v1 = vsel %vm883_vm5, %v4655_v47, %v882_v39  ;;  %v891_v52 = vsel %vm883_vm5, %v882_v39, %v4655_v47  ;;  %v958_v51 = vmul.f32 %v4628_v0, %v941_v24  ;;  %v1017_v17 = vmul.f32 %v4717_v33, %v993_v9  ;;  %v5418_v39 = vld [vmem:[#allocation34_spill] sm:$0xff]  ;;  %v5419_v9 = vld [vmem:[#allocation32_spill] sm:$0xff] }
 0x38a   :  { %v970_v37 = vadd.f32 %v962_v62, %v917_v19  ;;  %v971_v14 = vadd.f32 %v963_v12, %v918_v44  ;;  %v911_v10 = vmul.f32 %v4694_v6, %v887_v1  ;;  %v912_v54 = vmul.f32 %v4697_v43, %v891_v52 }
 0x38b   :  { %v1018_v23 = vmul.f32 %v4720_v40, %v997_v25  ;;  %v959_v44 = vmul.f32 %v4631_v46, %v937_v55  ;;  %v990_v25 = vsel %vm883_vm5, %v5419_v9, %v5418_v39 }
 0x38c   :  { %v919_v47 = vadd.f32 %v911_v10, %v865_v28  ;;  %v920_v62 = vadd.f32 %v912_v54, %v866_v21  ;;  %v1079_v63 = vpop.permute.xlu0 %1078  ;;  %v1023_v18 = vadd.f32 %v1015_v5, %v970_v37  ;;  %v1024_v36 = vadd.f32 %v1016_v38, %v971_v14  ;;  %v792_v57 = vpop.permute.xlu1 %791  ;;  %v5417_v28 = vld [vmem:[#allocation35_spill] sm:$0xff] }
 0x38d   :  { %v1085_v27 = vsel %vm801_vm4, %v5416_v2, %v1079_v63  ;;  %v1089_v58 = vsel %vm801_vm4, %v1079_v63, %v5416_v2  ;;  %v802_v21 = vsel %vm801_vm4, %v5417_v28, %v792_v57  ;;  %v806_v12 = vsel %vm801_vm4, %v792_v57, %v5417_v28  ;;  %v5421_v2 = vld [vmem:[#allocation30_spill] sm:$0xff] }
 0x38e   :  { %v972_v16 = vadd.f32 %v964_v61, %v919_v47  ;;  %v973_v0 = vadd.f32 %v965_v8, %v920_v62  ;;  %v822_v5 = vmul.f32 %v4614_v29, %v806_v12  ;;  %v823_v38 = vmul.f32 %v4617_v26, %v802_v21  ;;  %v5420_v61 = vld [vmem:[#allocation38_spill] sm:$0xff]  ;;  %v3005_v47 = vld [vmem:[%s5334_s3 + $0x10] ss:$8 sm:$0x3] }
 0x38f   :  { %v1107_v24 = vmul.f32 %v4739_v3, %v1089_v58  ;;  %v1108_v19 = vmul.f32 %v4750_v32, %v1085_v27  ;;  %v994_v62 = vsel %vm883_vm5, %v5418_v39, %v5419_v9  ;;  %v1139_v27 = vmul.f32 %v4625_v45, %v5421_v2 }
 0x390   :  { %v1081_v1 = vpop.permute.xlu0 %1080  ;;  %v1025_v52 = vadd.f32 %v1017_v17, %v972_v16  ;;  %v1026_v37 = vadd.f32 %v1018_v23, %v973_v0  ;;  %v830_v14 = vadd.f32 %v822_v5, %v4724_v60  ;;  %v831_v29 = vadd.f32 %v823_v38, %v4736_v4  ;;  %v876_v54 = vpop.permute.xlu1 %875 }
 0x391   :  { %v1115_v10 = vadd.f32 %v1107_v24, %v1021_v42  ;;  %v1116_v26 = vadd.f32 %v1108_v19, %v1022_v35  ;;  %v884_v31 = vsel %vm883_vm5, %v5420_v61, %v876_v54  ;;  %v888_v46 = vsel %vm883_vm5, %v876_v54, %v5420_v61 }
 0x392   :  { %v1086_v8 = vsel %vm801_vm4, %v4726_v41, %v1081_v1  ;;  %v1090_v60 = vsel %vm801_vm4, %v1081_v1, %v4726_v41  ;;  %v859_v4 = vadd.f32 %v4648_v20, %v830_v14  ;;  %v860_v42 = vadd.f32 %v4651_v56, %v831_v29  ;;  %v5424_v29 = vld [vmem:[#allocation31_spill] sm:$0xff] }
 0x393   :  { %v905_v35 = vmul.f32 %v4694_v6, %v884_v31  ;;  %v906_v55 = vmul.f32 %v4697_v43, %v888_v46  ;;  %v1109_v63 = vmul.f32 %v4739_v3, %v1090_v60  ;;  %v1110_v41 = vmul.f32 %v4750_v32, %v1086_v8 }
 0x394   :  { %v1083_v20 = vpop.permute.xlu0 %1082  ;;  %v1144_v56 = vadd.f32 %v4674_v50, %v1115_v10  ;;  %v1155_v23 = vpop.permute.xlu1 %1154  ;;  %v1011_v58 = vmul.f32 %v4717_v33, %v990_v25  ;;  %v1180_v16 = vrot.slane %v3005_v47, %v4312_v30  ;;  %v1184_v50 = vrot.slane %v3005_v47, %v4586_v48  ;;  %v5422_v25 = vld [vmem:[#allocation37_spill] sm:$0xff] }
 0x395   :  { %v913_v17 = vadd.f32 %v905_v35, %v859_v4  ;;  %v914_v6 = vadd.f32 %v906_v55, %v860_v42  ;;  %v1087_v43 = vsel %vm801_vm4, %v4764_v13, %v1083_v20  ;;  %v1091_v57 = vsel %vm801_vm4, %v1083_v20, %v4764_v13 }
 0x396   :  { %v1012_v0 = vmul.f32 %v4720_v40, %v994_v62  ;;  %v1145_v12 = vadd.f32 %v4678_v59, %v1116_v26  ;;  %v1117_v5 = vadd.f32 %v1109_v63, %v1023_v18  ;;  %v1118_v38 = vadd.f32 %v1110_v41, %v1024_v36 }
 0x397   :  { %v966_v28 = vadd.f32 %v958_v51, %v913_v17  ;;  %v967_v21 = vadd.f32 %v959_v44, %v914_v6  ;;  %v1111_v24 = vmul.f32 %v4739_v3, %v1091_v57  ;;  %v1112_v13 = vmul.f32 %v4750_v32, %v1087_v43  ;;  %v5423_v44 = vld [vmem:[#allocation29_spill] sm:$0xff] }
 0x398   :  { %v1161_v19 = vpop.permute.xlu0 %1160  ;;  %v1077_v9 = vpop.permute.xlu1 %1076  ;;  %v1140_v14 = vmul.f32 %v4622_v15, %v5423_v44  ;;  %v1141_v10 = vmul.f32 %v4625_v45, %v5424_v29 }
 0x399   :  { %v1019_v39 = vadd.f32 %v1011_v58, %v966_v28  ;;  %v1020_v33 = vadd.f32 %v1012_v0, %v967_v21  ;;  %v1167_v1 = vsel %vm883_vm5, %v5422_v25, %v1161_v19  ;;  %v1171_v40 = vsel %vm883_vm5, %v1161_v19, %v5422_v25 }
 0x39a   :  { %v1084_v59 = vsel %vm801_vm4, %v4687_v34, %v1077_v9  ;;  %v1088_v51 = vsel %vm801_vm4, %v1077_v9, %v4687_v34  ;;  %v1189_v18 = vmul.f32 %v1180_v16, %v1167_v1  ;;  %v1190_v36 = vmul.f32 %v1184_v50, %v1171_v40 }
 0x39b   :  { %v1105_v26 = vmul.f32 %v4739_v3, %v1088_v51  ;;  %v1106_v54 = vmul.f32 %v4750_v32, %v1084_v59  ;;  %v1119_v61 = vadd.f32 %v1111_v24, %v1025_v52  ;;  %v1120_v31 = vadd.f32 %v1112_v13, %v1026_v37 }
 0x39c   :  { %v4893_v46 = vadd.f32 %v1189_v18, %v1144_v56  ;;  %v4895_v8 = vadd.f32 %v1190_v36, %v1145_v12  ;;  %v1163_v60 = vpop.permute.xlu0 %1162  ;;  %v1159_v42 = vpop.permute.xlu1 %1158  ;;  %v1146_v52 = vadd.f32 %v4714_v7, %v1117_v5  ;;  %v1147_v37 = vadd.f32 %v1139_v27, %v1118_v38 }
 0x39d   :  { %v1113_v34 = vadd.f32 %v1105_v26, %v1019_v39  ;;  %v1114_v4 = vadd.f32 %v1106_v54, %v1020_v33  ;;  %v1168_v15 = vsel %vm883_vm5, %v1155_v23, %v1163_v60  ;;  %v1172_v45 = vsel %vm883_vm5, %v1163_v60, %v1155_v23 }
 0x39e   :  { %v1166_v3 = vsel %vm883_vm5, %v4790_v22, %v1159_v42  ;;  %v1170_v32 = vsel %vm883_vm5, %v1159_v42, %v4790_v22  ;;  %v1191_v63 = vmul.f32 %v1180_v16, %v1168_v15  ;;  %v1192_v41 = vmul.f32 %v1184_v50, %v1172_v45 }
 0x39f   :  { %v1142_v35 = vadd.f32 %v4706_v49, %v1113_v34  ;;  %v1143_v55 = vadd.f32 %v4710_v53, %v1114_v4  ;;  %v1187_v47 = vmul.f32 %v1180_v16, %v1166_v3  ;;  %v1188_v62 = vmul.f32 %v1184_v50, %v1170_v32 }
 0x3a0   :  { %v1148_v20 = vadd.f32 %v1140_v14, %v1119_v61  ;;  %v1149_v56 = vadd.f32 %v1141_v10, %v1120_v31  ;;  %v1165_v17 = vpop.permute.xlu0 %1164  ;;  %v1293_v6 = vmul.f32 %v4893_v46, %v4893_v46  ;;  %v1294_v22 = vmul.f32 %v4895_v8, %v4895_v8  ;;  %v1157_v49 = vpop.permute.xlu1 %1156 }
 0x3a1   :  { %v4914_v23 = vadd.f32 %v1187_v47, %v1142_v35  ;;  %v4916_v7 = vadd.f32 %v1188_v62, %v1143_v55  ;;  %v4918_v43 = vadd.f32 %v1191_v63, %v1146_v52  ;;  %v4920_v53 = vadd.f32 %v1192_v41, %v1147_v37  ;;  %v5425_v63 = vld [vmem:[#allocation28_spill] sm:$0xff] }
 0x3a2   :  { %v1169_v57 = vsel %vm883_vm5, %v1157_v49, %v1165_v17  ;;  %v1173_v2 = vsel %vm883_vm5, %v1165_v17, %v1157_v49  ;;  %v5426_v41 = vmov 0.0  }
 0x3a3   :  { %v1203_v27 = vadd.f32 %v4893_v46, %v4914_v23  ;;  %v1212_v58 = vadd.f32 %v4895_v8, %v4916_v7  ;;  %v1291_v0 = vmul.f32 %v4914_v23, %v4914_v23  ;;  %v1292_v28 = vmul.f32 %v4916_v7, %v4916_v7 }
 0x3a4   :  { %v1295_v21 = vmul.f32 %v4918_v43, %v4918_v43  ;;  %v1296_v12 = vmul.f32 %v4920_v53, %v4920_v53  ;;  %v1193_v11 = vmul.f32 %v1180_v16, %v1169_v57  ;;  %v1194_v5 = vmul.f32 %v1184_v50, %v1173_v2 }
 0x3a5   :  { %v1299_v38 = vadd.f32 %v1293_v6, %v1291_v0  ;;  %v1308_v24 = vadd.f32 %v1294_v22, %v1292_v28  ;;  %v1204_v13 = vadd.f32 %v1203_v27, %v4918_v43  ;;  %v1213_v19 = vadd.f32 %v1212_v58, %v4920_v53 }
 0x3a6   :  { %v4940_v39 = vadd.f32 %v1193_v11, %v1148_v20  ;;  %v4942_v9 = vadd.f32 %v1194_v5, %v1149_v56  ;;  %v5427_v20 = vld [vmem:[#allocation5_spill] sm:$0xff] }
 0x3a7   :  { %v1300_v33 = vadd.f32 %v1299_v38, %v1295_v21  ;;  %v1309_v25 = vadd.f32 %v1308_v24, %v1296_v12  ;;  %v48_v21 = vld [vmem:[%s5341_s10 + $0x2] sm:$0x1]  ;;  %v49_v5 = vld [vmem:[%s5341_s10 + $0x3] sm:$0x1] }
 0x3a8   :  { %v1205_v1 = vadd.f32 %v1204_v13, %v4940_v39  ;;  %v1214_v40 = vadd.f32 %v1213_v19, %v4942_v9  ;;  %v1297_v16 = vmul.f32 %v4940_v39, %v4940_v39  ;;  %v1298_v50 = vmul.f32 %v4942_v9, %v4942_v9  ;;  %v5428_v13 = vld [vmem:[#allocation6_spill] sm:$0xff]  ;;  %v5429_v19 = vld [vmem:[#allocation7_spill] sm:$0xff] }
 0x3aa   :  { %v1206_v59 = vrot.slane %v1205_v1, 4  ;;  %v1301_v51 = vadd.f32 %v1300_v33, %v1297_v16  ;;  %v1215_v18 = vrot.slane %v1214_v40, 4  ;;  %v1310_v36 = vadd.f32 %v1309_v25, %v1298_v50  ;;  %v5430_v33 = vld [vmem:[#allocation8_spill] sm:$0xff]  ;;  %v5431_v25 = vld [vmem:[#allocation9_spill] sm:$0xff] }
 0x3ab   :  { %v5434_v16 = vld [vmem:[#allocation12_spill] sm:$0xff]  ;;  %v5435_v50 = vld [vmem:[#allocation13_spill] sm:$0xff] }
 0x3ac   :  { %v1207_v44 = vadd.f32 %v1206_v59, %v1205_v1  ;;  %v1302_v14 = vrot.slane %v1301_v51, 4  ;;  %v1216_v29 = vadd.f32 %v1215_v18, %v1214_v40  ;;  %v1311_v10 = vrot.slane %v1310_v36, 4  ;;  %v5432_v1 = vld [vmem:[#allocation10_spill] sm:$0xff]  ;;  %v5433_v40 = vld [vmem:[#allocation11_spill] sm:$0xff]  ;;  %v5438_v18 = vld [vmem:[#allocation16_spill] sm:$0xff] }
 0x3ad   :  { %v5436_v59 = vld [vmem:[#allocation14_spill] sm:$0xff] }
 0x3ae   :  { %v1217_v26 = vrot.slane %v1216_v29, 2  ;;  %v1208_v54 = vrot.slane %v1207_v44, 2  ;;  %v1312_v61 = vadd.f32 %v1311_v10, %v1310_v36  ;;  %v1303_v31 = vadd.f32 %v1302_v14, %v1301_v51  ;;  %v5437_v51 = vld [vmem:[#allocation15_spill] sm:$0xff]  ;;  %v5439_v36 = vld [vmem:[#allocation17_spill] sm:$0xff] }
 0x3af   :  { %v5441_v14 = vld [vmem:[#allocation19_spill] sm:$0xff] }
 0x3b0   :  { %v1218_v60 = vadd.f32 %v1217_v26, %v1216_v29  ;;  %v1209_v34 = vadd.f32 %v1208_v54, %v1207_v44  ;;  %v1313_v4 = vrot.slane %v1312_v61, 2  ;;  %v1304_v42 = vrot.slane %v1303_v31, 2  ;;  %v5440_v44 = vld [vmem:[#allocation18_spill] sm:$0xff]  ;;  %v5442_v29 = vld [vmem:[#allocation20_spill] sm:$0xff] }
 0x3b2   :  { %v1219_v15 = vrot.slane %v1218_v60, 1  ;;  %v1210_v45 = vrot.slane %v1209_v34, 1  ;;  %v1314_v3 = vadd.f32 %v1313_v4, %v1312_v61  ;;  %v1305_v32 = vadd.f32 %v1304_v42, %v1303_v31 }
 0x3b4   :  { %v1220_v52 = vadd.f32 %v1219_v15, %v1218_v60  ;;  %v1211_v37 = vadd.f32 %v1210_v45, %v1209_v34  ;;  %v1315_v35 = vrot.slane %v1314_v3, 1  ;;  %v1306_v55 = vrot.slane %v1305_v32, 1 }
 0x3b6   :  { %1285 = vmatprep.mubr.f32.mxu0 %v1220_v52  ;;  %v1316_v47 = vadd.f32 %v1315_v35, %v1314_v3  ;;  %v1307_v62 = vadd.f32 %v1306_v55, %v1305_v32 }
 0x3b7   :  { %1286 = vmatmul.mubr.f32.vlgmr.msra.gmra.mrb[12].mxu0 %v1211_v37 }
 0x3b8   :  { %1381 = vmatprep.mubr.f32.mxu1 %v1316_v47  ;;  %3650 = vmatpush1.bf16.msra.mxu0 %v5425_v63 }
 0x3b9   :  { %1382 = vmatmul.mubr.f32.vlgmr.msra.gmra.mrb[8].mxu1 %v1307_v62  ;;  %1463 = vmatprep.mubr.f32.mxu0 %v5426_v41 }
 0x3ba   :  { %3654 = vmatpush1.bf16.msra.mxu1 %v5425_v63  ;;  %1537 = vmatprep.mubr.f32.mxu1 %v5426_v41 }
 0x3bb   :  { %3664 = vmatprep.subr.bf16.mxu1 %v5427_v20 }
 0x48a   :  { %v3145_v56 = vpop.f32.mrb[12].mxu0 }
 0x48b   :  { %v3146_v17 = vpop.f32.mrb[13].mxu0 }
 0x48c   :  { %v3147_v6 = vadd.f32 %v3146_v17, %v3145_v56  ;;  %v3180_v22 = vpop.f32.mrb[8].mxu1  ;;  %v1576_v56 = vld [vmem:[%s5340_s9] sm:$0x3] }
 0x48d   :  { %v3181_v49 = vpop.f32.mrb[9].mxu1 }
 0x48e   :  { %v1387_v57 = vmul.f32 0.001953125, %v3147_v6  ;;  %v3182_v2 = vadd.f32 %v3181_v49, %v3180_v22  ;;  %v1723_v22 = vld [vmem:[%s5342_s11] sm:$0xff]  ;;  %v1724_v49 = vld [vmem:[%s5342_s11 + $0x8] sm:$0xff] }
 0x490   :  { %v1389_v27 = vmul.f32 %v1387_v57, %v1387_v57  ;;  %v1388_v58 = vmul.f32 0.001953125, %v3182_v2  ;;  %v3696_v2 = vpack.c.bf16 %v1724_v49, %v1723_v22 }
 0x492   :  { %v1390_v0 = vsub.f32 %v1388_v58, %v1389_v27 }
 0x494   :  { %v1391_v28 = vadd.f32 1e-05, %v1390_v0 }
 0x496   :  { %3848 = vrsqrt.f32 %v1391_v28 }
 0x4a0   :  { %v3849_v12 = vpop.eup %3848 }
 0x4a1   :  { %v1393_v11 = vmul.f32 %v3849_v12, %v48_v21  ;;  %v1834_v21 = vld [vmem:[%s5343_s12] sm:$0xf]  ;;  %v5443_v12 = vld [vmem:[#allocation27_spill] sm:$0xff] }
 0x4a3   :  { %3006 = vmatmul.mubr.msk.f32.vlgmr.msra.gmra.mrb[14].mxu0 %vm490_vm1, %v1393_v11  ;;  %v1394_v38 = vmul.f32 %v1393_v11, %v1387_v57  ;;  %v3887_v57 = vmov 0.0|0.0  }
 0x4a4   :  { %1645 = vmatprep.mubr.f32.mxu0 %v5426_v41 }
 0x4a5   :  { %v1395_v24 = vsub.f32 %v49_v5, %v1394_v38 }
 0x4a7   :  { %3007 = vmatmul.mubr.msk.f32.vlgmr.msra.gmra.mrb[10].mxu1 %vm490_vm1, %v1395_v24 }
 0x4a8   :  { %3666 = vmatpush3.bf16.msra.mxu1 %v5428_v13 }
 0x4a9   :  { %3668 = vmatprep.subr.bf16.mxu1 %v5429_v19 }
 0x4ac   :  { %3670 = vmatpush3.bf16.msra.mxu1 %v5430_v33 }
 0x4ad   :  { %3672 = vmatprep.subr.bf16.mxu1 %v5431_v25 }
 0x4b0   :  { %3674 = vmatpush3.bf16.msra.mxu1 %v5432_v1 }
 0x4b1   :  { %3676 = vmatprep.subr.bf16.mxu1 %v5433_v40 }
 0x4b4   :  { %3678 = vmatpush3.bf16.msra.mxu1 %v5434_v16 }
 0x4b5   :  { %3680 = vmatprep.subr.bf16.mxu1 %v5435_v50 }
 0x4b8   :  { %3682 = vmatpush3.bf16.msra.mxu1 %v5436_v59 }
 0x4b9   :  { %3684 = vmatprep.subr.bf16.mxu1 %v5437_v51 }
 0x4bc   :  { %3686 = vmatpush3.bf16.msra.mxu1 %v5438_v18 }
 0x4bd   :  { %3688 = vmatprep.subr.bf16.mxu1 %v5439_v36 }
 0x4c0   :  { %3690 = vmatpush3.bf16.msra.mxu1 %v5440_v44 }
 0x4c1   :  { %3692 = vmatprep.subr.bf16.mxu1 %v5441_v14 }
 0x4c4   :  { %3694 = vmatpush3.bf16.msra.mxu1 %v5442_v29 }
 0x4c5   :  { %3702 = vmatprep.subr.bf16.mxu1 %v3887_v57 }
 0x576   :  { %v1465_v10 = vpop.f32.mrb[14].mxu0 }
 0x577   :  { %v1547_v26 = vrot.slane %v1465_v10, %v4312_v30  ;;  %v1467_v54 = vpop.f32.mrb[15].mxu0 }
 0x578   :  { %v1551_v61 = vrot.slane %v1467_v54, %v4312_v30 }
 0x579   :  { %v1552_v31 = vmul.f32 %v1547_v26, %v4914_v23  ;;  %v1554_v60 = vmul.f32 %v1547_v26, %v4893_v46  ;;  %v1556_v4 = vmul.f32 %v1547_v26, %v4918_v43  ;;  %v1558_v42 = vmul.f32 %v1547_v26, %v4940_v39 }
 0x57a   :  { %v1539_v34 = vpop.f32.mrb[10].mxu1  ;;  %v1553_v3 = vmul.f32 %v1551_v61, %v4916_v7  ;;  %v1555_v52 = vmul.f32 %v1551_v61, %v4895_v8  ;;  %v1557_v37 = vmul.f32 %v1551_v61, %v4920_v53  ;;  %v1559_v23 = vmul.f32 %v1551_v61, %v4942_v9 }
 0x57b   :  { %v1563_v15 = vrot.slane %v1539_v34, %v4312_v30  ;;  %v1541_v45 = vpop.f32.mrb[11].mxu1 }
 0x57c   :  { %v1567_v32 = vrot.slane %v1541_v45, %v4312_v30 }
 0x57d   :  { %v4991_v35 = vadd.f32 %v1563_v15, %v1552_v31  ;;  %v4993_v46 = vadd.f32 %v1563_v15, %v1554_v60  ;;  %v4995_v43 = vadd.f32 %v1563_v15, %v1556_v4  ;;  %v4997_v39 = vadd.f32 %v1563_v15, %v1558_v42  ;;  %v3010_v60 = vld [vmem:[%s5341_s10 + $0x8] ss:$0 sm:$0xff]  ;;  %v3011_v4 = vld [vmem:[%s5341_s10 + $0x9] ss:$0 sm:$0xff] }
 0x57e   :  { %v4999_v55 = vadd.f32 %v1567_v32, %v1553_v3  ;;  %v5001_v47 = vadd.f32 %v1567_v32, %v1555_v52  ;;  %v5003_v7 = vadd.f32 %v1567_v32, %v1557_v37  ;;  %v5005_v62 = vadd.f32 %v1567_v32, %v1559_v23  ;;  %v3830_v3 = vld [vmem:[%s5333_s2 + $0x40] sm:$0xff]  }
 0x57f   :  { %v3657_v53 = vpack.c.bf16 %v4993_v46, %v4991_v35  ;;  %v3661_v20 = vpack.c.bf16 %v4997_v39, %v4995_v43 }
 0x580   :  { %v3655_v8 = vpack.c.bf16 %v5001_v47, %v4999_v55  ;;  %v3659_v9 = vpack.c.bf16 %v5005_v62, %v5003_v7 }
 0x582   :  { %3656 = vmatprep.subr.bf16.mxu0 %v3655_v8 }
 0x583   :  { %3658 = vmatpush1.bf16.msra.mxu0 %v3657_v53 }
 0x584   :  { %3660 = vmatprep.subr.bf16.mxu0 %v3659_v9 }
 0x587   :  { %3662 = vmatpush1.bf16.msra.mxu0 %v3661_v20 }
 0x588   :  { %3695 = vmatprep.subr.bf16.mxu0 %v3887_v57 }
 0x58a   :  { %3008 = vmatmul.mubr.msk.f32.vlgmr.msra.gmra.mrb[16].mxu0 %vm1577_vm6, %v1576_v56 }
 0x58b   :  { %3343 = vmatprep.mubr.msk.f32.mxu0 %vm3888_vm7, %v5426_v41  ;;  %3697 = vmatpush3.bf16.msra.mxu0 %v3696_v2 }
 0x58c   :  { %3346 = vmatprep.subr.mxu0 %v5426_v41 }
 0x65d   :  { %v1647_v17 = vpop.f32.mrb[16].mxu0 }
 0x65e   :  { %v1649_v6 = vpop.f32.mrb[17].mxu0 }
 0x65f   :  { %1716 = vmatprep.mubr.f32.mxu1 %v1649_v6 }
 0x660   :  { %1717 = vmatmul.mubr.f32.vlgmr.msra.gmra.mrb[12].mxu1 %v1647_v17 }
 0x661   :  { %3383 = vmatprep.mubr.msk.f32.mxu1 %vm3888_vm7, %v5426_v41 }
 0x733   :  { %v3215_v27 = vpop.f32.mrb[12].mxu1 }
 0x734   :  { %v3216_v58 = vpop.f32.mrb[13].mxu1 }
 0x735   :  { %v3217_v0 = vadd.f32 %v3216_v58, %v3215_v27 }
 0x737   :  { %v1722_v28 = vmul.f32 0.00390625, %v3217_v0 }
 0x739   :  { %3344 = vmatmul.mubr.msk.f32.vlgmr.msra.gmra.mrb[18].mxu0 %vm490_vm1, %v1722_v28 }
 0x73a   :  { %3348 = vmatprep.mubr.msk.f32.mxu0 %vm3888_vm7, %v5426_v41  ;;  %3347 = vmatpush3.msk.msra.mxu0 %vm1839_vm8, %v1834_v21 }
 0x73b   :  { %3699 = vmatprep.subr.bf16.mxu0 %v5443_v12 }
 0x80c   :  { %v1794_v11 = vpop.f32.mrb[18].mxu0 }
 0x80d   :  { %v1799_v5 = vsel %vm1798_vm9, %v1794_v11, 0.0  ;;  %v1808_v38 = vmul.f32 %v1794_v11, %v1794_v11  ;;  %v3345_v24 = vpop.f32.mrb[19].mxu0 }
 0x80e   :  { %v1800_v13 = vrot.slane %v1799_v5, 4  ;;  %v3014_v24 = vld [vmem:[%s5341_s10 + $0xa] ss:$0 sm:$0xff] }
 0x80f   :  { %v1809_v19 = vsel %vm1798_vm9, %v1808_v38, 0.0 }
 0x810   :  { %v1801_v33 = vadd.f32 %v1800_v13, %v1799_v5  ;;  %v1810_v25 = vrot.slane %v1809_v19, 4 }
 0x812   :  { %v1802_v1 = vrot.slane %v1801_v33, 2  ;;  %v1811_v40 = vadd.f32 %v1810_v25, %v1809_v19  ;;  %v3015_v19 = vld [vmem:[%s5341_s10 + $0xb] ss:$0 sm:$0xff] }
 0x814   :  { %v1803_v16 = vadd.f32 %v1802_v1, %v1801_v33  ;;  %v1812_v50 = vrot.slane %v1811_v40, 2 }
 0x816   :  { %v1804_v59 = vrot.slane %v1803_v16, 1  ;;  %v1813_v51 = vadd.f32 %v1812_v50, %v1811_v40  ;;  %v3831_v50 = vld [vmem:[%s5333_s2] sm:$0xff]  }
 0x818   :  { %v1805_v18 = vadd.f32 %v1804_v59, %v1803_v16  ;;  %v1814_v36 = vrot.slane %v1813_v51, 1 }
 0x81a   :  { %v1807_v44 = vmul.f32 0.5, %v1805_v18  ;;  %v1815_v14 = vadd.f32 %v1814_v36, %v1813_v51  ;;  %v3832_v51 = vld [vmem:[%s5333_s2 + $0x48] sm:$0xff]   ;;  %v3834_v36 = vld [vmem:[%s5333_s2 + $0x50] sm:$0xff]  }
 0x81b   :  { %v3833_v18 = vld [vmem:[%s5333_s2 + $0x8] sm:$0xff]  }
 0x81c   :  { %v1816_v29 = vmul.f32 0.5, %v1815_v14  ;;  %v1817_v10 = vmul.f32 %v1807_v44, %v1807_v44  ;;  %v1819_v61 = vsub.f32 %v1794_v11, %v1807_v44  ;;  %v3835_v44 = vld [vmem:[%s5333_s2 + $0x10] sm:$0xff]   ;;  %v3836_v14 = vld [vmem:[%s5333_s2 + $0x58] sm:$0xff]  }
 0x81e   :  { %v1818_v26 = vsub.f32 %v1816_v29, %v1817_v10  ;;  %v3837_v29 = vld [vmem:[%s5333_s2 + $0x18] sm:$0xff]   ;;  %v3838_v10 = vld [vmem:[%s5333_s2 + $0x60] sm:$0xff]  }
 0x820   :  { %v1820_v54 = vadd.f32 1e-05, %v1818_v26  ;;  %v3839_v26 = vld [vmem:[%s5333_s2 + $0x20] sm:$0xff]  }
 0x822   :  { %3850 = vrsqrt.f32 %v1820_v54  ;;  %v3840_v54 = vld [vmem:[%s5333_s2 + $0x68] sm:$0xff]  }
 0x82c   :  { %v3851_v31 = vpop.eup %3850 }
 0x82d   :  { %v1822_v34 = vmul.f32 %v3851_v31, %v1819_v61  ;;  %v3841_v61 = vld [vmem:[%s5333_s2 + $0x28] sm:$0xff]   ;;  %v3842_v31 = vld [vmem:[%s5333_s2 + $0x70] sm:$0xff]  }
 0x82f   :  { %v1827_v42 = vmul.f32 %v3010_v60, %v1822_v34  ;;  %v3843_v60 = vld [vmem:[%s5333_s2 + $0x30] sm:$0xff]   ;;  %v3844_v34 = vld [vmem:[%s5333_s2 + $0x78] sm:$0xff]  }
 0x831   :  { %v1832_v15 = vadd.f32 %v3011_v4, %v1827_v42  ;;  %v3845_v4 = vld [vmem:[%s5333_s2 + $0x38] sm:$0xff]   ;;  %v2270_v42 = vld [vmem:[%s5338_s7] sm:$0xff] }
 0x833   :  { %v1833_v45 = vmax.f32 %v1832_v15, 0.0  ;;  %v2271_v15 = vld [vmem:[%s5338_s7 + $0x8] sm:$0xff] }
 0x835   :  { %3349 = vmatmul.mubr.msk.f32.vlgmr.msra.gmra.mrb[20].mxu0 %vm1835_vm10, %v1833_v45  ;;  %v5107_v45 = vpack.c.bf16 %v2271_v15, %v2270_v42  ;;  %v2272_v42 = vld [vmem:[%s5338_s7 + $0x10] sm:$0xff]  ;;  %v2273_v15 = vld [vmem:[%s5338_s7 + $0x18] sm:$0xff] }
 0x836   :  { %3701 = vmatpush1.bf16.msra.mxu0 %v5425_v63  ;;  %2018 = vmatprep.mubr.f32.mxu0 %v5426_v41 }
 0x837   :  { %3223 = vmatprep.subr.bf16.mxu0 %v3830_v3  ;;  %3704 = vmatpush3.bf16.msra.mxu1 %v5107_v45 }
 0x838   :  { %3705 = vmatprep.subr.bf16.mxu1 %v3887_v57 }
 0x908   :  { %v1909_v32 = vpop.f32.mrb[20].mxu0 }
 0x909   :  { %v1914_v52 = vsel %vm1913_vm11, %v1909_v32, 0.0  ;;  %v1922_v37 = vmul.f32 %v1909_v32, %v1909_v32  ;;  %v3350_v23 = vpop.f32.mrb[21].mxu0 }
 0x90a   :  { %v1915_v8 = vrot.slane %v1914_v52, 4 }
 0x90b   :  { %v1923_v53 = vsel %vm1913_vm11, %v1922_v37, 0.0 }
 0x90c   :  { %v1916_v9 = vadd.f32 %v1915_v8, %v1914_v52  ;;  %v1924_v20 = vrot.slane %v1923_v53, 4 }
 0x90e   :  { %v1917_v56 = vrot.slane %v1916_v9, 2  ;;  %v1925_v17 = vadd.f32 %v1924_v20, %v1923_v53 }
 0x910   :  { %v1918_v6 = vadd.f32 %v1917_v56, %v1916_v9  ;;  %v1926_v63 = vrot.slane %v1925_v17, 2 }
 0x912   :  { %v1919_v22 = vrot.slane %v1918_v6, 1  ;;  %v1927_v49 = vadd.f32 %v1926_v63, %v1925_v17 }
 0x914   :  { %v1920_v2 = vadd.f32 %v1919_v22, %v1918_v6  ;;  %v1928_v27 = vrot.slane %v1927_v49, 1 }
 0x916   :  { %v1921_v58 = vmul.f32 0.5, %v1920_v2  ;;  %v1929_v0 = vadd.f32 %v1928_v27, %v1927_v49 }
 0x918   :  { %v1930_v28 = vmul.f32 0.5, %v1929_v0  ;;  %v1931_v21 = vmul.f32 %v1921_v58, %v1921_v58  ;;  %v1933_v5 = vsub.f32 %v1909_v32, %v1921_v58 }
 0x91a   :  { %v1932_v12 = vsub.f32 %v1930_v28, %v1931_v21 }
 0x91c   :  { %v1934_v11 = vadd.f32 1e-05, %v1932_v12 }
 0x91e   :  { %3852 = vrsqrt.f32 %v1934_v11 }
 0x928   :  { %v3853_v38 = vpop.eup %3852 }
 0x929   :  { %v1936_v13 = vmul.f32 %v3853_v38, %v1933_v5 }
 0x92b   :  { %v1941_v33 = vmul.f32 %v3014_v24, %v1936_v13 }
 0x92d   :  { %v1946_v25 = vadd.f32 %v3015_v19, %v1941_v33 }
 0x92f   :  { %v1947_v1 = vadd.f32 3.0, %v1946_v25 }
 0x931   :  { %v1948_v40 = vmax.f32 %v1947_v1, 0.0 }
 0x933   :  { %v1949_v16 = vmin.f32 %v1948_v40, 6.0 }
 0x935   :  { %v1950_v59 = vmul.f32 0.16666667, %v1949_v16 }
 0x937   :  { %3016 = vmatmul.mubr.msk.f32.vlgmr.msra.gmra.mrb[22].mxu0 %vm490_vm1, %v1950_v59 }
 0x938   :  { %3224 = vmatpush3.bf16.msra.mxu0 %v3831_v50 }
 0x939   :  { %3225 = vmatprep.subr.bf16.mxu0 %v3832_v51 }
 0x93c   :  { %3226 = vmatpush3.bf16.msra.mxu0 %v3833_v18 }
 0x93d   :  { %3227 = vmatprep.subr.bf16.mxu0 %v3834_v36 }
 0x940   :  { %3228 = vmatpush3.bf16.msra.mxu0 %v3835_v44 }
 0x941   :  { %3229 = vmatprep.subr.bf16.mxu0 %v3836_v14 }
 0x944   :  { %3230 = vmatpush3.bf16.msra.mxu0 %v3837_v29 }
 0x945   :  { %3231 = vmatprep.subr.bf16.mxu0 %v3838_v10 }
 0x948   :  { %3232 = vmatpush3.bf16.msra.mxu0 %v3839_v26 }
 0x949   :  { %3233 = vmatprep.subr.bf16.mxu0 %v3840_v54 }
 0x94c   :  { %3234 = vmatpush3.bf16.msra.mxu0 %v3841_v61 }
 0x94d   :  { %3235 = vmatprep.subr.bf16.mxu0 %v3842_v31 }
 0x950   :  { %3236 = vmatpush3.bf16.msra.mxu0 %v3843_v60 }
 0x951   :  { %3237 = vmatprep.subr.bf16.mxu0 %v3844_v34 }
 0x954   :  { %3238 = vmatpush3.bf16.msra.mxu0 %v3845_v4 }
 0x955   :  { %3726 = vmatprep.subr.bf16.mxu0 %v3887_v57 }
 0xa0a   :  { %v2020_v3 = vpop.f32.mrb[22].mxu0 }
 0xa0b   :  { %v2028_v32 = vrot.slane %v2020_v3, %v4312_v30  ;;  %v2040_v52 = vrot.slane %v2020_v3, %v4586_v48  ;;  %v2022_v37 = vpop.f32.mrb[23].mxu0  ;;  %v5134_v3 = vpack.c.bf16 %v2273_v15, %v2272_v42 }
 0xa0c   :  { %v2032_v23 = vrot.slane %v2022_v37, %v4312_v30  ;;  %v2044_v8 = vrot.slane %v2022_v37, %v4586_v48 }
 0xa0d   :  { %v2033_v53 = vmul.f32 %v2028_v32, %v4991_v35  ;;  %v2035_v9 = vmul.f32 %v2028_v32, %v4993_v46  ;;  %v2045_v20 = vmul.f32 %v2040_v52, %v4995_v43  ;;  %v2047_v56 = vmul.f32 %v2040_v52, %v4997_v39  ;;  %3707 = vmatpush3.bf16.msra.mxu1 %v5134_v3  ;;  %v2274_v32 = vld [vmem:[%s5338_s7 + $0x20] sm:$0xff]  ;;  %v2275_v52 = vld [vmem:[%s5338_s7 + $0x28] sm:$0xff] }
 0xa0e   :  { %v2034_v17 = vmul.f32 %v2032_v23, %v4999_v55  ;;  %v2036_v6 = vmul.f32 %v2032_v23, %v5001_v47  ;;  %v2046_v63 = vmul.f32 %v2044_v8, %v5003_v7  ;;  %v2048_v22 = vmul.f32 %v2044_v8, %v5005_v62  ;;  %3708 = vmatprep.subr.bf16.mxu1 %v3887_v57  ;;  %v2276_v23 = vld [vmem:[%s5338_s7 + $0x30] sm:$0xff]  ;;  %v2277_v8 = vld [vmem:[%s5338_s7 + $0x38] sm:$0xff] }
 0xa0f   :  { %v2049_v49 = vadd.f32 3.0, %v2033_v53  ;;  %v2051_v2 = vadd.f32 3.0, %v2035_v9  ;;  %v2053_v27 = vadd.f32 3.0, %v2045_v20  ;;  %v2055_v48 = vadd.f32 3.0, %v2047_v56 }
 0xa10   :  { %v2050_v58 = vadd.f32 3.0, %v2034_v17  ;;  %v2052_v35 = vadd.f32 3.0, %v2036_v6  ;;  %v2054_v0 = vadd.f32 3.0, %v2046_v63  ;;  %v2056_v46 = vadd.f32 3.0, %v2048_v22 }
 0xa11   :  { %v2057_v28 = vmax.f32 %v2049_v49, 0.0  ;;  %v2059_v43 = vmax.f32 %v2051_v2, 0.0  ;;  %v2061_v11 = vmax.f32 %v2053_v27, 0.0  ;;  %v2063_v47 = vmax.f32 %v2055_v48, 0.0  ;;  %v2283_v49 = vld [vmem:[%s5338_s7 + $0x68] sm:$0xff]  ;;  %v2284_v27 = vld [vmem:[%s5338_s7 + $0x70] sm:$0xff] }
 0xa12   :  { %v2058_v21 = vmax.f32 %v2050_v58, 0.0  ;;  %v2060_v39 = vmax.f32 %v2052_v35, 0.0  ;;  %v2062_v12 = vmax.f32 %v2054_v0, 0.0  ;;  %v2064_v55 = vmax.f32 %v2056_v46, 0.0  ;;  %v2285_v48 = vld [vmem:[%s5338_s7 + $0x78] sm:$0xff] }
 0xa13   :  { %v2065_v5 = vmin.f32 %v2057_v28, 6.0  ;;  %v2067_v7 = vmin.f32 %v2059_v43, 6.0  ;;  %v2069_v50 = vmin.f32 %v2061_v11, 6.0  ;;  %v2071_v59 = vmin.f32 %v2063_v47, 6.0 }
 0xa14   :  { %v2066_v38 = vmin.f32 %v2058_v21, 6.0  ;;  %v2068_v62 = vmin.f32 %v2060_v39, 6.0  ;;  %v2070_v24 = vmin.f32 %v2062_v12, 6.0  ;;  %v2072_v13 = vmin.f32 %v2064_v55, 6.0 }
 0xa15   :  { %v2073_v19 = vmul.f32 %v2065_v5, %v2033_v53  ;;  %v2075_v33 = vmul.f32 %v2067_v7, %v2035_v9  ;;  %v2077_v26 = vmul.f32 %v2069_v50, %v2045_v20  ;;  %v2079_v54 = vmul.f32 %v2071_v59, %v2047_v56  ;;  %v2278_v9 = vld [vmem:[%s5338_s7 + $0x40] sm:$0xff]  ;;  %v2279_v20 = vld [vmem:[%s5338_s7 + $0x48] sm:$0xff]  ;;  %v2280_v56 = vld [vmem:[%s5338_s7 + $0x50] sm:$0xff] }
 0xa16   :  { %v2074_v25 = vmul.f32 %v2066_v38, %v2034_v17  ;;  %v2076_v1 = vmul.f32 %v2068_v62, %v2036_v6  ;;  %v2078_v40 = vmul.f32 %v2070_v24, %v2046_v63  ;;  %v2080_v16 = vmul.f32 %v2072_v13, %v2048_v22  ;;  %v2281_v6 = vld [vmem:[%s5338_s7 + $0x58] sm:$0xff]  ;;  %v2282_v22 = vld [vmem:[%s5338_s7 + $0x60] sm:$0xff] }
 0xa17   :  { %v2081_v51 = vmul.f32 0.16666667, %v2073_v19  ;;  %v2083_v18 = vmul.f32 0.16666667, %v2075_v33  ;;  %v2085_v60 = vmul.f32 0.16666667, %v2077_v26  ;;  %v5146_v37 = vpack.c.bf16 %v2275_v52, %v2274_v32 }
 0xa18   :  { %v2082_v36 = vmul.f32 0.16666667, %v2074_v25  ;;  %v2084_v44 = vmul.f32 0.16666667, %v2076_v1  ;;  %v2086_v14 = vmul.f32 0.16666667, %v2078_v40  ;;  %v5158_v53 = vpack.c.bf16 %v2277_v8, %v2276_v23 }
 0xa19   :  { %v2088_v29 = vmul.f32 0.16666667, %v2080_v16  ;;  %v2089_v61 = vpack.c.bf16 %v2083_v18, %v2081_v51  ;;  %v2087_v34 = vmul.f32 0.16666667, %v2079_v54  ;;  %3710 = vmatpush3.bf16.msra.mxu1 %v5146_v37  ;;  %v5173_v17 = vpack.c.bf16 %v2279_v20, %v2278_v9  ;;  %v5256_v32 = vld [vmem:[%s5339_s8] sm:$0xff] }
 0xa1a   :  { %v2090_v10 = vpack.c.bf16 %v2084_v44, %v2082_v36  ;;  %3711 = vmatprep.subr.bf16.mxu1 %v3887_v57  ;;  %v5180_v63 = vpack.c.bf16 %v2281_v6, %v2280_v56  ;;  %v5192_v2 = vpack.c.bf16 %v2283_v49, %v2282_v22  ;;  %v5204_v58 = vpack.c.bf16 %v2285_v48, %v2284_v27  ;;  %v50_v27 = vld [vmem:[%s5341_s10 + $0x4] sm:$0x1] }
 0xa1b   :  { %v2092_v31 = vpack.c.bf16 %v2088_v29, %v2086_v14  ;;  %v2091_v4 = vpack.c.bf16 %v2087_v34, %v2085_v60 }
 0xa1c   :  { %2253 = vmatprep.mubr.bf16.mxu0 %v2090_v10 }
 0xa1d   :  { %2254 = vmatmul.mubr.bf16.vlgmr.msra.gmra.mrb[24].mxu0 %v2089_v61  ;;  %3713 = vmatpush3.bf16.msra.mxu1 %v5158_v53  ;;  %v5444_v61 = vld [vmem:[#allocation26_spill] sm:$0xff] }
 0xa1e   :  { %2261 = vmatprep.mubr.bf16.mxu0 %v2092_v31  ;;  %3728 = vmatpush3.bf16.msra.mxu0 %v5107_v45  ;;  %v2707_v31 = vrot.slane %v5444_v61, 4 }
 0xa1f   :  { %3729 = vmatprep.subr.bf16.mxu0 %v3887_v57  ;;  %3714 = vmatprep.subr.bf16.mxu1 %v3887_v57 }
 0xa20   :  { %v2708_v60 = vadd.f32 %v2707_v31, %v5444_v61  ;;  %v5446_v61 = vld [vmem:[#allocation22_spill] sm:$0xff] }
 0xa21   :  { %3716 = vmatpush3.bf16.msra.mxu1 %v5173_v17 }
 0xa22   :  { %3731 = vmatpush3.bf16.msra.mxu0 %v5134_v3  ;;  %3717 = vmatprep.subr.bf16.mxu1 %v3887_v57  ;;  %v2709_v34 = vrot.slane %v2708_v60, 2 }
 0xa23   :  { %3732 = vmatprep.subr.bf16.mxu0 %v3887_v57 }
 0xa25   :  { %2262 = vmatmul.mubr.bf16.gmra.mrb[28].mxu0 %v2091_v4  ;;  %3719 = vmatpush3.bf16.msra.mxu1 %v5180_v63  ;;  %v2710_v4 = vadd.f32 %v2709_v34, %v2708_v60  ;;  %v5447_v60 = vld [vmem:[#allocation24_spill] sm:$0xff] }
 0xa26   :  { %3418 = vmatprep.mubr.msk.f32.mxu0 %vm3888_vm7, %v5426_v41  ;;  %3734 = vmatpush3.bf16.msra.mxu0 %v5146_v37 }
 0xa27   :  { %3735 = vmatprep.subr.bf16.mxu0 %v3887_v57  ;;  %3720 = vmatprep.subr.bf16.mxu1 %v3887_v57  ;;  %v2711_v42 = vrot.slane %v2710_v4, 1 }
 0xa29   :  { %3722 = vmatpush3.bf16.msra.mxu1 %v5192_v2  ;;  %v2712_v15 = vadd.f32 %v2711_v42, %v2710_v4  ;;  %v5448_v4 = vld [vmem:[#allocation21_spill] sm:$0xff] }
 0xa2a   :  { %3737 = vmatpush3.bf16.msra.mxu0 %v5158_v53  ;;  %3723 = vmatprep.subr.bf16.mxu1 %v3887_v57 }
 0xa2b   :  { %3738 = vmatprep.subr.bf16.mxu0 %v3887_v57 }
 0xa2d   :  { %3725 = vmatpush3.bf16.msra.mxu1 %v5204_v58 }
 0xa2e   :  { %3740 = vmatpush3.bf16.msra.mxu0 %v5173_v17  ;;  %3421 = vmatprep.subr.mxu1 %v5426_v41 }
 0xa2f   :  { %3741 = vmatprep.subr.bf16.mxu0 %v3887_v57 }
 0xa32   :  { %3743 = vmatpush3.bf16.msra.mxu0 %v5180_v63 }
 0xa33   :  { %3744 = vmatprep.subr.bf16.mxu0 %v3887_v57 }
 0xa36   :  { %3746 = vmatpush3.bf16.msra.mxu0 %v5192_v2 }
 0xa37   :  { %3747 = vmatprep.subr.bf16.mxu0 %v3887_v57 }
 0xa3a   :  { %3749 = vmatpush3.bf16.msra.mxu0 %v5204_v58 }
 0xa3b   :  { %3774 = vmatprep.subr.bf16.mxu0 %v3887_v57 }
 0xaf0   :  { %v3239_v35 = vpop.f32.mrb[24].mxu0 }
 0xaf1   :  { %v3240_v0 = vpop.f32.mrb[25].mxu0 }
 0xaf2   :  { %v5212_v46 = vadd.f32 %v3240_v0, %v3239_v35  ;;  %v3242_v28 = vpop.f32.mrb[26].mxu0  ;;  %v51_v0 = vld [vmem:[%s5341_s10 + $0x5] sm:$0x1] }
 0xaf3   :  { %v3243_v43 = vpop.f32.mrb[27].mxu0 }
 0xaf4   :  { %v5214_v21 = vadd.f32 %v3243_v43, %v3242_v28  ;;  %v2366_v11 = vmul.f32 %v5212_v46, %v5212_v46 }
 0xaf6   :  { %v2367_v39 = vmul.f32 %v5214_v21, %v5214_v21  ;;  %v2287_v47 = vadd.f32 %v5214_v21, %v5212_v46 }
 0xaf8   :  { %v3245_v12 = vpop.f32.mrb[28].mxu0  ;;  %v2370_v62 = vadd.f32 %v2367_v39, %v2366_v11 }
 0xaf9   :  { %v3246_v55 = vpop.f32.mrb[29].mxu0 }
 0xafa   :  { %v5222_v5 = vadd.f32 %v3246_v55, %v3245_v12  ;;  %v3248_v7 = vpop.f32.mrb[30].mxu0  ;;  %v5445_v55 = vld [vmem:[#allocation25_spill] sm:$0xff] }
 0xafb   :  { %v3249_v38 = vpop.f32.mrb[31].mxu0  ;;  %v2624_v11 = vrot.slane %v5445_v55, 4 }
 0xafc   :  { %v2288_v24 = vadd.f32 %v5222_v5, %v2287_v47  ;;  %v2368_v13 = vmul.f32 %v5222_v5, %v5222_v5  ;;  %v5227_v19 = vadd.f32 %v3249_v38, %v3248_v7 }
 0xafe   :  { %v2371_v33 = vadd.f32 %v2370_v62, %v2368_v13  ;;  %v2289_v25 = vadd.f32 %v5227_v19, %v2288_v24  ;;  %v2369_v1 = vmul.f32 %v5227_v19, %v5227_v19 }
 0xb00   :  { %v2290_v40 = vrot.slane %v2289_v25, 4  ;;  %v2372_v16 = vadd.f32 %v2371_v33, %v2369_v1 }
 0xb02   :  { %v2291_v50 = vadd.f32 %v2290_v40, %v2289_v25  ;;  %v2373_v59 = vrot.slane %v2372_v16, 4 }
 0xb04   :  { %v2292_v51 = vrot.slane %v2291_v50, 2  ;;  %v2374_v18 = vadd.f32 %v2373_v59, %v2372_v16 }
 0xb06   :  { %v2293_v36 = vadd.f32 %v2292_v51, %v2291_v50  ;;  %v2375_v44 = vrot.slane %v2374_v18, 2 }
 0xb08   :  { %v2376_v14 = vadd.f32 %v2375_v44, %v2374_v18  ;;  %v2294_v29 = vrot.slane %v2293_v36, 1  ;;  %v53_v44 = vld [vmem:[%s5341_s10 + $0x7] sm:$0x1] }
 0xb0a   :  { %v2377_v10 = vrot.slane %v2376_v14, 1  ;;  %v2295_v26 = vadd.f32 %v2294_v29, %v2293_v36 }
 0xb0c   :  { %3384 = vmatmul.mubr.f32.vlgmr.msra.gmra.mrb[14].mxu1 %v2295_v26  ;;  %v2378_v54 = vadd.f32 %v2377_v10, %v2376_v14 }
 0xb0d   :  { %3423 = vmatprep.mubr.msk.f32.mxu1 %vm3888_vm7, %v5426_v41  ;;  %3422 = vmatpush3.msra.mxu1 %v5256_v32 }
 0xb0e   :  { %3419 = vmatmul.mubr.f32.vlgmr.msra.gmra.mrb[32].mxu0 %v2378_v54  ;;  %3426 = vmatprep.subr.mxu1 %v5426_v41 }
 0xb0f   :  { %3776 = vmatpush3.bf16.msra.mxu0 %v5107_v45  ;;  %3498 = vmatprep.mubr.msk.f32.mxu0 %vm3888_vm7, %v5426_v41 }
 0xb10   :  { %3777 = vmatprep.subr.bf16.mxu0 %v3887_v57 }
 0xb13   :  { %3779 = vmatpush3.bf16.msra.mxu0 %v5134_v3 }
 0xb14   :  { %3780 = vmatprep.subr.bf16.mxu0 %v3887_v57 }
 0xb17   :  { %3782 = vmatpush3.bf16.msra.mxu0 %v5146_v37 }
 0xb18   :  { %3783 = vmatprep.subr.bf16.mxu0 %v3887_v57 }
 0xb1b   :  { %3785 = vmatpush3.bf16.msra.mxu0 %v5158_v53 }
 0xb1c   :  { %3786 = vmatprep.subr.bf16.mxu0 %v3887_v57 }
 0xb1f   :  { %3788 = vmatpush3.bf16.msra.mxu0 %v5173_v17 }
 0xb20   :  { %3789 = vmatprep.subr.bf16.mxu0 %v3887_v57 }
 0xb23   :  { %3791 = vmatpush3.bf16.msra.mxu0 %v5180_v63 }
 0xb24   :  { %3792 = vmatprep.subr.bf16.mxu0 %v3887_v57 }
 0xb27   :  { %3794 = vmatpush3.bf16.msra.mxu0 %v5192_v2 }
 0xb28   :  { %3795 = vmatprep.subr.bf16.mxu0 %v3887_v57 }
 0xb2b   :  { %3797 = vmatpush3.bf16.msra.mxu0 %v5204_v58 }
 0xb2e   :  { %3499 = vmatmul.mubr.f32.vlgmr.msra.gmra.mrb[34].mxu0 %v2712_v15  ;;  %v5449_v15 = vld [vmem:[#allocation23_spill] sm:$0xff] }
 0xbdf   :  { %v2362_v52 = vpop.f32.mrb[14].mxu1 }
 0xbe0   :  { %v2449_v23 = vmul.f32 0.001953125, %v2362_v52  ;;  %v3385_v8 = vpop.f32.mrb[15].mxu1 }
 0xbe1   :  { %v2445_v9 = vpop.f32.mrb[32].mxu0 }
 0xbe2   :  { %v2451_v20 = vmul.f32 %v2449_v23, %v2449_v23  ;;  %v2450_v56 = vmul.f32 0.001953125, %v2445_v9  ;;  %v3420_v6 = vpop.f32.mrb[33].mxu0 }
 0xbe4   :  { %v2452_v22 = vsub.f32 %v2450_v56, %v2451_v20 }
 0xbe6   :  { %v2453_v49 = vadd.f32 1e-05, %v2452_v22 }
 0xbe8   :  { %3854 = vrsqrt.f32 %v2453_v49 }
 0xbf2   :  { %v3855_v48 = vpop.eup %3854 }
 0xbf3   :  { %v2455_v35 = vmul.f32 %v3855_v48, %v50_v27 }
 0xbf5   :  { %3424 = vmatmul.mubr.msk.f32.vlgmr.msra.gmra.mrb[16].mxu1 %vm2458_vm12, %v2455_v35  ;;  %v2456_v28 = vmul.f32 %v2455_v35, %v2449_v23 }
 0xbf6   :  { %3427 = vmatpush3.msra.mxu1 %v5256_v32  ;;  %3428 = vmatprep.mubr.msk.f32.mxu1 %vm3888_vm7, %v5426_v41 }
 0xbf7   :  { %3750 = vmatprep.subr.bf16.mxu1 %v3887_v57  ;;  %v2457_v43 = vsub.f32 %v51_v0, %v2456_v28 }
 0xbf9   :  { %3429 = vmatmul.mubr.msk.f32.vlgmr.msra.gmra.mrb[18].mxu1 %vm2458_vm12, %v2457_v43 }
 0xbfa   :  { %3752 = vmatpush3.bf16.msra.mxu1 %v5107_v45  ;;  %3463 = vmatprep.mubr.msk.f32.mxu1 %vm3888_vm7, %v5426_v41  ;;  %v2625_v45 = vadd.f32 %v2624_v11, %v5445_v55 }
 0xbfb   :  { %3753 = vmatprep.subr.bf16.mxu1 %v3887_v57 }
 0xbfe   :  { %3755 = vmatpush3.bf16.msra.mxu1 %v5134_v3  ;;  %v2626_v3 = vrot.slane %v2625_v45, 2 }
 0xbff   :  { %3756 = vmatprep.subr.bf16.mxu1 %v3887_v57 }
 0xc01   :  { %v2779_v39 = vpop.f32.mrb[34].mxu0 }
 0xc02   :  { %3758 = vmatpush3.bf16.msra.mxu1 %v5146_v37  ;;  %v3500_v12 = vpop.f32.mrb[35].mxu0  ;;  %v2627_v37 = vadd.f32 %v2626_v3, %v2625_v45  ;;  %v2784_v51 = vmul.f32 0.001953125, %v2779_v39 }
 0xc03   :  { %3759 = vmatprep.subr.bf16.mxu1 %v3887_v57 }
 0xc04   :  { %v2628_v47 = vrot.slane %v2627_v37, 1 }
 0xc06   :  { %3761 = vmatpush3.bf16.msra.mxu1 %v5158_v53  ;;  %v2629_v53 = vadd.f32 %v2628_v47, %v2627_v37 }
 0xc07   :  { %3762 = vmatprep.subr.bf16.mxu1 %v3887_v57 }
 0xc0a   :  { %3764 = vmatpush3.bf16.msra.mxu1 %v5173_v17 }
 0xc0b   :  { %3765 = vmatprep.subr.bf16.mxu1 %v3887_v57 }
 0xc0e   :  { %3767 = vmatpush3.bf16.msra.mxu1 %v5180_v63 }
 0xc0f   :  { %3768 = vmatprep.subr.bf16.mxu1 %v3887_v57 }
 0xc12   :  { %3770 = vmatpush3.bf16.msra.mxu1 %v5192_v2 }
 0xc13   :  { %3771 = vmatprep.subr.bf16.mxu1 %v3887_v57 }
 0xc16   :  { %3773 = vmatpush3.bf16.msra.mxu1 %v5204_v58 }
 0xc17   :  { %3501 = vmatprep.subr.mxu1 %v5426_v41 }
 0xc19   :  { %3464 = vmatmul.mubr.f32.vlgmr.msra.gmra.mrb[20].mxu1 %v2629_v53 }
 0xc1a   :  { %3502 = vmatpush3.msra.mxu1 %v5256_v32  ;;  %3503 = vmatprep.mubr.msk.f32.mxu1 %vm3888_vm7, %v5426_v41 }
 0xc1b   :  { %3506 = vmatprep.subr.mxu1 %v5426_v41 }
 0xcc8   :  { %v2528_v17 = vpop.f32.mrb[16].mxu1 }
 0xcc9   :  { %v2608_v63 = vrot.slane %v2528_v17, %v4312_v30  ;;  %v3425_v2 = vpop.f32.mrb[17].mxu1 }
 0xccb   :  { %v2609_v57 = vmul.f32 %v5212_v46, %v2608_v63  ;;  %v2610_v58 = vmul.f32 %v5214_v21, %v2608_v63  ;;  %v2611_v38 = vmul.f32 %v5222_v5, %v2608_v63  ;;  %v2612_v62 = vmul.f32 %v5227_v19, %v2608_v63  ;;  %v52_v21 = vld [vmem:[%s5341_s10 + $0x6] sm:$0x1]  ;;  %s3889_s10 = smov [#allocation2]  }
 0xccc   :  { %v2601_v7 = vpop.f32.mrb[18].mxu1  ;;  %s2967_s12 = sshll.u32 %s3889_s10, 4  ;;  %s2968_s12 = int_to_ptr.vmem [resolvable:$true] %s2967_s12 }
 0xccd   :  { %v2616_v24 = vrot.slane %v2601_v7, %v4312_v30  ;;  %v3430_v13 = vpop.f32.mrb[19].mxu1  ;;  %s3858_s30 = scalar_lea.vmem %s2968_s12, 512  ;;  %p3863_p1 = scmp.lt.s32.totalorder %s2968_s12, %s2968_s12 }
 0xcce   :  { %p3859_p0 = scmp.ne.s32.totalorder %s2968_s12, %s3858_s30  ;;  %p3864_p2 = scmp.lt.s32.totalorder %s3858_s30, %s3858_s30 }
 0xccf   :  { %v2617_v33 = vadd.f32 %v2616_v24, %v2609_v57  ;;  %v2618_v25 = vadd.f32 %v2616_v24, %v2610_v58  ;;  %v2619_v1 = vadd.f32 %v2616_v24, %v2611_v38  ;;  %v2620_v40 = vadd.f32 %v2616_v24, %v2612_v62 }
 0xcd0   :  { %p3865_p3 = por %p3864_p2, %p3863_p1 }
 0xcd2   :  { %p3866_p4 = pnand %p3865_p3, %p3859_p0 }
 0xcec   :  { %v2696_v16 = vpop.f32.mrb[20].mxu1 }
 0xced   :  { %v2783_v50 = vmul.f32 0.001953125, %v2696_v16  ;;  %v3465_v59 = vpop.f32.mrb[21].mxu1 }
 0xcef   :  { %v2785_v18 = vmul.f32 %v2783_v50, %v2783_v50 }
 0xcf1   :  { %v2786_v46 = vsub.f32 %v2784_v51, %v2785_v18 }
 0xcf3   :  { %v2787_v36 = vadd.f32 1e-05, %v2786_v46 }
 0xcf5   :  { %3856 = vrsqrt.f32 %v2787_v36 }
 0xcff   :  { %v3857_v5 = vpop.eup %3856 }
 0xd00   :  { %v2789_v19 = vmul.f32 %v3857_v5, %v52_v21 }
 0xd02   :  { %v2790_v14 = vmul.f32 %v2789_v19, %v2783_v50  ;;  %3504 = vmatmul.mubr.msk.f32.vlgmr.msra.gmra.mrb[22].mxu1 %vm2458_vm12, %v2789_v19 }
 0xd03   :  { %3507 = vmatpush3.msra.mxu1 %v5256_v32  ;;  %3508 = vmatprep.mubr.msk.f32.mxu1 %vm3888_vm7, %v5426_v41 }
 0xd04   :  { %v2791_v29 = vsub.f32 %v53_v44, %v2790_v14 }
 0xd06   :  { %3509 = vmatmul.mubr.msk.f32.vlgmr.msra.gmra.mrb[24].mxu1 %vm2458_vm12, %v2791_v29 }
 0xdd5   :  { %v2861_v10 = vpop.f32.mrb[22].mxu1 }
 0xdd6   :  { %v2941_v26 = vrot.slane %v2861_v10, %v4312_v30  ;;  %v3505_v54 = vpop.f32.mrb[23].mxu1 }
 0xdd8   :  { %v2942_v31 = vmul.f32 %v2941_v26, %v5446_v61  ;;  %v2943_v34 = vmul.f32 %v2941_v26, %v5447_v60  ;;  %v2944_v42 = vmul.f32 %v5448_v4, %v2941_v26  ;;  %v2945_v52 = vmul.f32 %v5449_v15, %v2941_v26 }
 0xdd9   :  { %v2934_v23 = vpop.f32.mrb[24].mxu1 }
 0xdda   :  { %v2949_v32 = vrot.slane %v2934_v23, %v4312_v30  ;;  %v3510_v8 = vpop.f32.mrb[25].mxu1 }
 0xddc   :  { %v2950_v41 = vadd.f32 %v2949_v32, %v2942_v31  ;;  %v2951_v9 = vadd.f32 %v2949_v32, %v2943_v34  ;;  %v2952_v20 = vadd.f32 %v2949_v32, %v2944_v42  ;;  %v2953_v56 = vadd.f32 %v2949_v32, %v2945_v52 }
 0xdde   :  { %v2954_v6 = vadd.f32 %v2950_v41, %v2617_v33  ;;  %v2955_v22 = vadd.f32 %v2951_v9, %v2618_v25  ;;  %v2956_v49 = vadd.f32 %v2952_v20, %v2619_v1  ;;  %v2957_v27 = vadd.f32 %v2953_v56, %v2620_v40 }
 0xde0   :  { %2958 = vst [vmem:[#allocation2] sm:$0xff] %v2954_v6  ;;  %2959 = vst [vmem:[#allocation2 + $0x8] sm:$0xff] %v2955_v22 }
 0xde1   :  { %2960 = vst [vmem:[#allocation2 + $0x10] sm:$0xff] %v2956_v49  ;;  %2961 = vst [vmem:[#allocation2 + $0x18] sm:$0xff] %v2957_v27 }
 0xde2   :  { %3869 = shalt.err (!%p3866_p4)
}
 0xde3   :  { %s3870_s6 = scalar_lea.hbm %s5344_s13, 512 }
 0xde4   :  { %p3871_p5 = scmp.ne.s32.totalorder %s5344_s13, %s3870_s6  ;;  %p3874_p6 = scmp.lt.u32.totalorder %s3870_s6, %s5344_s13 }
 0xde6   :  { %p3876_p7 = pnand %p3874_p6, %p3871_p5 }
 0xde8   :  { %3879 = shalt.err (!%p3876_p7)
}
 0xde9   :  { %s3890_s18 = smov 128   ;;  %s3891_s19 = smov 8  }
 0xdea   :  { %2973 = dma.vmem_to_hbm [thread:$0]  %s2968_s12, 512, %s5344_s13, [#allocation3], %s3890_s18, %s3890_s18, %s3891_s19  }
 0xdeb   :  { %3880 = dma.done.wait [#allocation3], 512  }
 0xdec   :  { %3881 = vsyncadd [#allocation3], 4294966784 }
 0xded   :  { %2977 = vsyncpa [#allocation3], 1 }

</bundles_post_ra>
